<compile_context>
chip_gen: v6e
topology: v6e:2x2x1
jax: 0.10.0
libtpu: 0.0.40
codegen_flags: <defaults>
</compile_context>

<pallas_src>
import math
import functools

import jax
import jax.numpy as jnp
from jax import lax
from jax.experimental import pallas as pl
from jax.experimental.pallas import tpu as pltpu


# ----------------------------------------------------------------------------
# Kernels
# ----------------------------------------------------------------------------
def _layernorm(z, g, b, eps=1e-5):
    # f32 math for mean / variance.
    mu = jnp.mean(z, axis=-1, keepdims=True)
    var = jnp.mean((z - mu) ** 2, axis=-1, keepdims=True)
    return (z - mu) * lax.rsqrt(var + eps) * g + b


def transformer_layer_kernel(x_ref, pad_ref,
                             ln1_g_ref, ln1_b_ref,
                             wqkv_ref, bqkv_ref, wo_ref, bo_ref,
                             ln2_g_ref, ln2_b_ref,
                             w1_ref, b1_ref, w2_ref, b2_ref,
                             y_ref, k_out_ref, v_out_ref,
                             *, heads, causal):
    f32, bf16 = jnp.float32, jnp.bfloat16
    x = x_ref[0]                                  # (S, D) f32
    S, D = x.shape
    hd = D // heads
    scale = 1.0 / math.sqrt(hd)

    # ---- additive mask bias built on-chip (no dense (S,S) DMA) ----
    pad_row = pad_ref[0]                          # (1, S) f32, 1.0 at pad tokens
    masked = jnp.broadcast_to(pad_row, (S, S)) > 0.5
    if causal:
        rows = lax.broadcasted_iota(jnp.int32, (S, S), 0)
        cols = lax.broadcasted_iota(jnp.int32, (S, S), 1)
        masked = jnp.logical_or(masked, cols > rows)
    neg_bias = jnp.where(masked, jnp.float32(-10000.0), jnp.float32(0.0))

    # ---- LN1 + fused head-major Q/K/V projection (single batched matmul) ----
    a = _layernorm(x, ln1_g_ref[...], ln1_b_ref[...]).astype(bf16)
    a3 = jnp.broadcast_to(a[None], (3 * heads, S, D))
    qkv = jnp.einsum('hsd,hdf->hsf', a3, wqkv_ref[...],
                     preferred_element_type=f32) + bqkv_ref[...]   # (3H, S, hd)
    q3 = qkv[0:heads]
    k3 = qkv[heads:2 * heads]
    v3 = qkv[2 * heads:3 * heads]

    # ---- batched multi-head attention (all heads in one MXU phase each) ----
    s = jnp.einsum('hqd,hkd->hqk', q3.astype(bf16), k3.astype(bf16),
                   preferred_element_type=f32) * scale
    s = s + neg_bias[None]
    s = s - jnp.max(s, axis=-1, keepdims=True)
    p = jnp.exp(s)
    p = p * pl.reciprocal(jnp.sum(p, axis=-1, keepdims=True), approx=True)
    o3 = jnp.einsum('hqk,hkd->hqd', p.astype(bf16), v3.astype(bf16),
                    preferred_element_type=f32)                     # (H, S, hd)

    # ---- output projection with the head-merge folded in ----
    per_head = jnp.einsum('hsf,hfd->hsd', o3.astype(bf16), wo_ref[...],
                          preferred_element_type=f32)               # (H, S, D)
    attn = jnp.sum(per_head, axis=0) + bo_ref[...]
    x1 = x + attn                                                   # residual 1

    # ---- position-wise feed-forward (Swish) ----
    a2 = _layernorm(x1, ln2_g_ref[...], ln2_b_ref[...]).astype(bf16)
    h1 = jnp.dot(a2, w1_ref[...], preferred_element_type=f32) + b1_ref[...]
    h1 = h1 * jax.nn.sigmoid(h1)                                    # Swish in f32
    ff = jnp.dot(h1.astype(bf16), w2_ref[...],
                 preferred_element_type=f32) + b2_ref[...]
    y_ref[0] = x1 + ff                                              # residual 2

    # presents in bf16 (cache dtype) — halves writeback DMA
    k_out_ref[0] = k3.astype(bf16)
    v_out_ref[0] = v3.astype(bf16)


def lm_head_kernel(x_ref, g_ref, b_ref, w_ref, out_ref):
    # x: (S, D) f32, w: (TN, D) bf16 vocab tile.  Contract on D directly
    # (transpose folded into MXU operand read — no materialized tok_emb.T).
    ln = _layernorm(x_ref[0], g_ref[...], b_ref[...]).astype(jnp.bfloat16)
    out_ref[0] = lax.dot_general(ln, w_ref[...], (((1,), (1,)), ((), ())),
                                 preferred_element_type=jnp.float32)


# ----------------------------------------------------------------------------
# pallas_call wrappers
# ----------------------------------------------------------------------------
def run_transformer_layer(x, pad_f, lp, heads, causal):
    B, S, D = x.shape
    hd = D // heads
    full = lambda a: pl.BlockSpec(a.shape, lambda b: (0,) * a.ndim)

    kernel = functools.partial(transformer_layer_kernel, heads=heads, causal=causal)
    y, k4, v4 = pl.pallas_call(
        kernel,
        out_shape=(
            jax.ShapeDtypeStruct((B, S, D), jnp.float32),
            jax.ShapeDtypeStruct((B, heads, S, hd), jnp.bfloat16),
            jax.ShapeDtypeStruct((B, heads, S, hd), jnp.bfloat16),
        ),
        grid=(B,),
        in_specs=[
            pl.BlockSpec((1, S, D), lambda b: (b, 0, 0)),      # x
            pl.BlockSpec((1, 1, S), lambda b: (b, 0, 0)),      # pad flags
            full(lp["ln1_g"]), full(lp["ln1_b"]),
            full(lp["wqkv"]), full(lp["bqkv"]),
            full(lp["wo"]), full(lp["bo"]),
            full(lp["ln2_g"]), full(lp["ln2_b"]),
            full(lp["w1"]), full(lp["b1"]),
            full(lp["w2"]), full(lp["b2"]),
        ],
        out_specs=(
            pl.BlockSpec((1, S, D), lambda b: (b, 0, 0)),
            pl.BlockSpec((1, heads, S, hd), lambda b: (b, 0, 0, 0)),
            pl.BlockSpec((1, heads, S, hd), lambda b: (b, 0, 0, 0)),
        ),
        compiler_params=pltpu.CompilerParams(
            dimension_semantics=("parallel",)),
    )(x, pad_f,
      lp["ln1_g"], lp["ln1_b"],
      lp["wqkv"], lp["bqkv"], lp["wo"], lp["bo"],
      lp["ln2_g"], lp["ln2_b"],
      lp["w1"], lp["b1"], lp["w2"], lp["b2"])

    # glue: merge heads back to the reference (B, S, D) "present" layout
    k = jnp.transpose(k4, (0, 2, 1, 3)).reshape(B, S, D)
    v = jnp.transpose(v4, (0, 2, 1, 3)).reshape(B, S, D)
    return y, (k, v)


def _vocab_tile(V):
    for t in (512, 256, 128):
        if V % t == 0:
            return t
    return V                                     # small / ragged vocab fallback


def run_lm_head(x, ln_g, ln_b, tok_emb):
    B, S, D = x.shape
    V = tok_emb.shape[0]
    TN = _vocab_tile(V)
    NV = V // TN
    full = lambda a: pl.BlockSpec(a.shape, lambda b, j: (0,) * a.ndim)
    return pl.pallas_call(
        lm_head_kernel,
        out_shape=jax.ShapeDtypeStruct((B, S, V), jnp.float32),
        grid=(B, NV),
        in_specs=[
            pl.BlockSpec((1, S, D), lambda b, j: (b, 0, 0)),
            full(ln_g), full(ln_b),
            pl.BlockSpec((TN, D), lambda b, j: (j, 0)),        # vocab tile of (V, D)
        ],
        out_specs=pl.BlockSpec((1, S, TN), lambda b, j: (b, 0, j)),
        compiler_params=pltpu.CompilerParams(
            dimension_semantics=("parallel", "parallel")),
    )(x, ln_g, ln_b, tok_emb)


# ----------------------------------------------------------------------------
# Full model forward (eval-mode semantics, past=None)
# ----------------------------------------------------------------------------
def transformer_forward(token_ids, params, *, heads, pad_idx, bidirectional):
    B, S = token_ids.shape

    # pad flags only (the full pad+causal bias is rebuilt on-chip per layer)
    pad_f = (token_ids == pad_idx).astype(jnp.float32)[:, None, :]   # (B, 1, S)

    # embeddings (glue gathers), f32 activations through the stack
    positions = jnp.arange(S)
    x = (params["tok_emb"][token_ids].astype(jnp.float32)
         + params["pos_emb"][positions][None].astype(jnp.float32))
    # dropout_embedding: identity (eval)

    presents = []
    for lp in params["layers"]:
        x, present = run_transformer_layer(x, pad_f, lp, heads,
                                           causal=not bidirectional)
        presents.append(present)

    logits = run_lm_head(x, params["ln_head_g"], params["ln_head_b"],
                         params["tok_emb"])
    return logits, presents


# ----------------------------------------------------------------------------
# Deterministic parameter init (weights stored head-major, bf16)
# ----------------------------------------------------------------------------
def _split_heads_in(w, heads):
    # (D, D_out) -> (H, D, hd): column block h*hd:(h+1)*hd becomes head h.
    D, Dout = w.shape
    hd = Dout // heads
    return jnp.transpose(w.reshape(D, heads, hd), (1, 0, 2))


def init_params(key, *, layers, words, seq_len, dims, rate, heads):
    keys = jax.random.split(key, 4 + layers)
    hd = dims // heads

    def normal(k, shape, std=0.02):
        return (std * jax.random.normal(k, shape)).astype(jnp.float32)

    params = {
        "tok_emb": normal(keys[0], (words, dims)).astype(jnp.bfloat16),
        "pos_emb": normal(keys[1], (seq_len, dims)).astype(jnp.bfloat16),
        "ln_head_g": jnp.ones((1, dims), jnp.float32),
        "ln_head_b": jnp.zeros((1, dims), jnp.float32),
        "layers": [],
    }
    for li in range(layers):
        lk = jax.random.split(keys[4 + li], 6)
        wq = normal(lk[0], (dims, dims))
        wk = normal(lk[1], (dims, dims))
        wv = normal(lk[2], (dims, dims))
        wo = normal(lk[3], (dims, dims))
        lp = {
            "ln1_g": jnp.ones((1, dims), jnp.float32),
            "ln1_b": jnp.zeros((1, dims), jnp.float32),
            # fused, head-major QKV weight: (3H, D, hd), bf16
            "wqkv": jnp.concatenate([_split_heads_in(wq, heads),
                                     _split_heads_in(wk, heads),
                                     _split_heads_in(wv, heads)],
                                    axis=0).astype(jnp.bfloat16),
            "bqkv": jnp.zeros((3 * heads, 1, hd), jnp.float32),
            # output projection, head-major rows: (H, hd, D), bf16
            "wo": wo.reshape(heads, hd, dims).astype(jnp.bfloat16),
            "bo": jnp.zeros((1, dims), jnp.float32),
            "ln2_g": jnp.ones((1, dims), jnp.float32),
            "ln2_b": jnp.zeros((1, dims), jnp.float32),
            "w1": normal(lk[4], (dims, dims * rate)).astype(jnp.bfloat16),
            "b1": jnp.zeros((1, dims * rate), jnp.float32),
            "w2": normal(lk[5], (dims * rate, dims)).astype(jnp.bfloat16),
            "b2": jnp.zeros((1, dims), jnp.float32),
        }
        params["layers"].append(lp)
    return params


# ----------------------------------------------------------------------------
if __name__ == "__main__":
    # Small config consistent with the module's constructor.
    LAYERS, PAD_IDX, WORDS, SEQ_LEN = 2, 0, 64, 8
    HEADS, DIMS, RATE = 4, 32, 4
    BIDIRECTIONAL = False   # GPT-style causal masking
    BATCH = 2

    key = jax.random.PRNGKey(0)
    pkey, xkey = jax.random.split(key)
    params = init_params(pkey, layers=LAYERS, words=WORDS, seq_len=SEQ_LEN,
                         dims=DIMS, rate=RATE, heads=HEADS)

    token_ids = jax.random.randint(xkey, (BATCH, SEQ_LEN), 0, WORDS, dtype=jnp.int32)

    logits, presents = transformer_forward(
        token_ids, params, heads=HEADS, pad_idx=PAD_IDX,
        bidirectional=BIDIRECTIONAL)

    logits = jax.block_until_ready(logits)
    for (k, v) in presents:
        jax.block_until_ready(k)
        jax.block_until_ready(v)

    assert logits.shape == (BATCH, SEQ_LEN, WORDS)
    assert all(k.shape == (BATCH, SEQ_LEN, DIMS) and v.shape == (BATCH, SEQ_LEN, DIMS)
               for (k, v) in presents)
    assert bool(jnp.all(jnp.isfinite(logits)))
    print("KERNEL_OK")
</pallas_src>

<mosaic_0001>
module attributes {stable_mosaic.version = 11 : i64} {
  func.func @transformer_layer_kernel(%arg0: i32, %arg1: memref<1x8x32xf32, #tpu.memory_space<vmem>>, %arg2: memref<1x1x8xf32, #tpu.memory_space<vmem>>, %arg3: memref<1x32xf32, #tpu.memory_space<vmem>>, %arg4: memref<1x32xf32, #tpu.memory_space<vmem>>, %arg5: memref<12x32x8xbf16, #tpu.memory_space<vmem>>, %arg6: memref<12x1x8xf32, #tpu.memory_space<vmem>>, %arg7: memref<4x8x32xbf16, #tpu.memory_space<vmem>>, %arg8: memref<1x32xf32, #tpu.memory_space<vmem>>, %arg9: memref<1x32xf32, #tpu.memory_space<vmem>>, %arg10: memref<1x32xf32, #tpu.memory_space<vmem>>, %arg11: memref<32x128xbf16, #tpu.memory_space<vmem>>, %arg12: memref<1x128xf32, #tpu.memory_space<vmem>>, %arg13: memref<128x32xbf16, #tpu.memory_space<vmem>>, %arg14: memref<1x32xf32, #tpu.memory_space<vmem>>, %arg15: memref<1x8x32xf32, #tpu.memory_space<vmem>>, %arg16: memref<1x4x8x8xbf16, #tpu.memory_space<vmem>>, %arg17: memref<1x4x8x8xbf16, #tpu.memory_space<vmem>>) attributes {dimension_semantics = [#tpu.dimension_semantics<parallel>], iteration_bounds = array<i64: 2>, scalar_prefetch = 0 : i64, scratch_operands = 0 : i64, tpu.core_type = #tpu.core_type<tc>, window_params = [{transform_indices = @transform_0, window_bounds = array<i64: 1, 8, 32>}, {transform_indices = @transform_1, window_bounds = array<i64: 1, 1, 8>}, {pipeline_mode = #tpu.pipeline_mode<synchronous>, transform_indices = @transform_2, window_bounds = array<i64: 1, 32>}, {pipeline_mode = #tpu.pipeline_mode<synchronous>, transform_indices = @transform_3, window_bounds = array<i64: 1, 32>}, {pipeline_mode = #tpu.pipeline_mode<synchronous>, transform_indices = @transform_4, window_bounds = array<i64: 12, 32, 8>}, {pipeline_mode = #tpu.pipeline_mode<synchronous>, transform_indices = @transform_5, window_bounds = array<i64: 12, 1, 8>}, {pipeline_mode = #tpu.pipeline_mode<synchronous>, transform_indices = @transform_6, window_bounds = array<i64: 4, 8, 32>}, {pipeline_mode = #tpu.pipeline_mode<synchronous>, transform_indices = @transform_7, window_bounds = array<i64: 1, 32>}, {pipeline_mode = #tpu.pipeline_mode<synchronous>, transform_indices = @transform_8, window_bounds = array<i64: 1, 32>}, {pipeline_mode = #tpu.pipeline_mode<synchronous>, transform_indices = @transform_9, window_bounds = array<i64: 1, 32>}, {pipeline_mode = #tpu.pipeline_mode<synchronous>, transform_indices = @transform_10, window_bounds = array<i64: 32, 128>}, {pipeline_mode = #tpu.pipeline_mode<synchronous>, transform_indices = @transform_11, window_bounds = array<i64: 1, 128>}, {pipeline_mode = #tpu.pipeline_mode<synchronous>, transform_indices = @transform_12, window_bounds = array<i64: 128, 32>}, {pipeline_mode = #tpu.pipeline_mode<synchronous>, transform_indices = @transform_13, window_bounds = array<i64: 1, 32>}, {transform_indices = @transform_14, window_bounds = array<i64: 1, 8, 32>}, {transform_indices = @transform_15, window_bounds = array<i64: 1, 4, 8, 8>}, {transform_indices = @transform_16, window_bounds = array<i64: 1, 4, 8, 8>}]} {
    %c0 = arith.constant 0 : index
    %c0_0 = arith.constant 0 : index
    %c0_1 = arith.constant 0 : index
    %0 = vector.load %arg1[%c0, %c0_0, %c0_1] : memref<1x8x32xf32, #tpu.memory_space<vmem>>, vector<1x8x32xf32>
    %1 = vector.shape_cast %0 : vector<1x8x32xf32> to vector<8x32xf32>
    %c0_2 = arith.constant 0 : index
    %c0_3 = arith.constant 0 : index
    %c0_4 = arith.constant 0 : index
    %2 = vector.load %arg2[%c0_2, %c0_3, %c0_4] : memref<1x1x8xf32, #tpu.memory_space<vmem>>, vector<1x1x8xf32>
    %3 = vector.shape_cast %2 : vector<1x1x8xf32> to vector<1x8xf32>
    %4 = vector.shape_cast %3 : vector<1x8xf32> to vector<1x8xf32>
    %5 = vector.broadcast %4 : vector<1x8xf32> to vector<8x8xf32>
    %cst = arith.constant 5.000000e-01 : f32
    %6 = vector.broadcast %cst : f32 to vector<8x8xf32>
    %7 = arith.cmpf ogt, %5, %6 : vector<8x8xf32>
    %8 = tpu.iota {dimensions = array<i32: 0>} : vector<8x8xi32>
    %9 = tpu.iota {dimensions = array<i32: 1>} : vector<8x8xi32>
    %10 = arith.cmpi sgt, %9, %8 : vector<8x8xi32>
    %11 = arith.ori %7, %10 : vector<8x8xi1>
    %cst_5 = arith.constant -1.000000e+04 : f32
    %cst_6 = arith.constant 0.000000e+00 : f32
    %12 = vector.broadcast %cst_5 : f32 to vector<8x8xf32>
    %13 = vector.broadcast %cst_6 : f32 to vector<8x8xf32>
    %14 = arith.select %11, %12, %13 : vector<8x8xi1>, vector<8x8xf32>
    %c0_7 = arith.constant 0 : index
    %c0_8 = arith.constant 0 : index
    %15 = vector.load %arg3[%c0_7, %c0_8] : memref<1x32xf32, #tpu.memory_space<vmem>>, vector<1x32xf32>
    %c0_9 = arith.constant 0 : index
    %c0_10 = arith.constant 0 : index
    %16 = vector.load %arg4[%c0_9, %c0_10] : memref<1x32xf32, #tpu.memory_space<vmem>>, vector<1x32xf32>
    %cst_11 = arith.constant dense<0.000000e+00> : vector<8xf32>
    %17 = vector.multi_reduction <add>, %1, %cst_11 [1] : vector<8x32xf32> to vector<8xf32>
    %18 = vector.shape_cast %17 : vector<8xf32> to vector<8x1xf32>
    %cst_12 = arith.constant 3.200000e+01 : f32
    %19 = vector.broadcast %cst_12 : f32 to vector<8x1xf32>
    %20 = arith.divf %18, %19 : vector<8x1xf32>
    %21 = vector.broadcast %20 : vector<8x1xf32> to vector<8x32xf32>
    %22 = arith.subf %1, %21 : vector<8x32xf32>
    %23 = arith.mulf %22, %22 : vector<8x32xf32>
    %cst_13 = arith.constant dense<0.000000e+00> : vector<8xf32>
    %24 = vector.multi_reduction <add>, %23, %cst_13 [1] : vector<8x32xf32> to vector<8xf32>
    %25 = vector.shape_cast %24 : vector<8xf32> to vector<8x1xf32>
    %cst_14 = arith.constant 3.200000e+01 : f32
    %26 = vector.broadcast %cst_14 : f32 to vector<8x1xf32>
    %27 = arith.divf %25, %26 : vector<8x1xf32>
    %28 = vector.broadcast %20 : vector<8x1xf32> to vector<8x32xf32>
    %29 = arith.subf %1, %28 : vector<8x32xf32>
    %cst_15 = arith.constant 9.99999974E-6 : f32
    %30 = vector.broadcast %cst_15 : f32 to vector<8x1xf32>
    %31 = arith.addf %27, %30 : vector<8x1xf32>
    %32 = math.rsqrt %31 : vector<8x1xf32>
    %33 = vector.broadcast %32 : vector<8x1xf32> to vector<8x32xf32>
    %34 = arith.mulf %29, %33 : vector<8x32xf32>
    %35 = vector.broadcast %15 : vector<1x32xf32> to vector<8x32xf32>
    %36 = arith.mulf %34, %35 : vector<8x32xf32>
    %37 = vector.broadcast %16 : vector<1x32xf32> to vector<8x32xf32>
    %38 = arith.addf %36, %37 : vector<8x32xf32>
    %39 = arith.truncf %38 : vector<8x32xf32> to vector<8x32xbf16>
    %40 = vector.shape_cast %39 : vector<8x32xbf16> to vector<1x8x32xbf16>
    %41 = vector.shape_cast %40 : vector<1x8x32xbf16> to vector<1x8x32xbf16>
    %42 = vector.broadcast %41 : vector<1x8x32xbf16> to vector<12x8x32xbf16>
    %c0_16 = arith.constant 0 : index
    %c0_17 = arith.constant 0 : index
    %c0_18 = arith.constant 0 : index
    %43 = vector.load %arg5[%c0_16, %c0_17, %c0_18] : memref<12x32x8xbf16, #tpu.memory_space<vmem>>, vector<12x32x8xbf16>
    "tpu.trace_start"() <{level = 10 : i32, message = "hsd,hdf->hsf"}> : () -> ()
    %cst_19 = arith.constant dense<0.000000e+00> : vector<12x8x8xf32>
    %44 = tpu.matmul %42, %43, %cst_19 {dimension_numbers = #tpu.dot_dimension_numbers<[2], [1], [1], [2], [0, 0, 0, 1, 1, 2], [0], [0]>} : vector<12x8x32xbf16>, vector<12x32x8xbf16>, vector<12x8x8xf32> -> vector<12x8x8xf32>
    "tpu.trace_stop"() : () -> ()
    %c0_20 = arith.constant 0 : index
    %c0_21 = arith.constant 0 : index
    %c0_22 = arith.constant 0 : index
    %45 = vector.load %arg6[%c0_20, %c0_21, %c0_22] : memref<12x1x8xf32, #tpu.memory_space<vmem>>, vector<12x1x8xf32>
    %46 = vector.broadcast %45 : vector<12x1x8xf32> to vector<12x8x8xf32>
    %47 = arith.addf %44, %46 : vector<12x8x8xf32>
    %48 = vector.extract_strided_slice %47 {offsets = [0, 0, 0], sizes = [4, 8, 8], strides = [1, 1, 1]} : vector<12x8x8xf32> to vector<4x8x8xf32>
    %49 = vector.extract_strided_slice %47 {offsets = [4, 0, 0], sizes = [4, 8, 8], strides = [1, 1, 1]} : vector<12x8x8xf32> to vector<4x8x8xf32>
    %50 = vector.extract_strided_slice %47 {offsets = [8, 0, 0], sizes = [4, 8, 8], strides = [1, 1, 1]} : vector<12x8x8xf32> to vector<4x8x8xf32>
    %51 = arith.truncf %48 : vector<4x8x8xf32> to vector<4x8x8xbf16>
    %52 = arith.truncf %49 : vector<4x8x8xf32> to vector<4x8x8xbf16>
    "tpu.trace_start"() <{level = 10 : i32, message = "hqd,hkd->hqk"}> : () -> ()
    %cst_23 = arith.constant dense<0.000000e+00> : vector<4x8x8xf32>
    %53 = tpu.matmul %51, %52, %cst_23 {dimension_numbers = #tpu.dot_dimension_numbers<[2], [2], [1], [1], [0, 0, 0, 1, 1, 1], [0], [0]>} : vector<4x8x8xbf16>, vector<4x8x8xbf16>, vector<4x8x8xf32> -> vector<4x8x8xf32>
    "tpu.trace_stop"() : () -> ()
    %cst_24 = arith.constant 0.353553385 : f32
    %54 = vector.broadcast %cst_24 : f32 to vector<4x8x8xf32>
    %55 = arith.mulf %53, %54 : vector<4x8x8xf32>
    %56 = vector.shape_cast %14 : vector<8x8xf32> to vector<1x8x8xf32>
    %57 = vector.broadcast %56 : vector<1x8x8xf32> to vector<4x8x8xf32>
    %58 = arith.addf %55, %57 : vector<4x8x8xf32>
    %cst_25 = arith.constant dense<0xFF800000> : vector<4x8xf32>
    %59 = vector.multi_reduction <maximumf>, %58, %cst_25 [2] : vector<4x8x8xf32> to vector<4x8xf32>
    %60 = vector.shape_cast %59 : vector<4x8xf32> to vector<4x8x1xf32>
    %61 = vector.broadcast %60 : vector<4x8x1xf32> to vector<4x8x8xf32>
    %62 = arith.subf %58, %61 : vector<4x8x8xf32>
    %63 = math.exp %62 : vector<4x8x8xf32>
    %cst_26 = arith.constant dense<0.000000e+00> : vector<4x8xf32>
    %64 = vector.multi_reduction <add>, %63, %cst_26 [2] : vector<4x8x8xf32> to vector<4x8xf32>
    %65 = vector.shape_cast %64 : vector<4x8xf32> to vector<4x8x1xf32>
    %66 = tpu.reciprocal %65 {approx = true} : vector<4x8x1xf32> -> vector<4x8x1xf32>
    %67 = vector.broadcast %66 : vector<4x8x1xf32> to vector<4x8x8xf32>
    %68 = arith.mulf %63, %67 : vector<4x8x8xf32>
    %69 = arith.truncf %68 : vector<4x8x8xf32> to vector<4x8x8xbf16>
    %70 = arith.truncf %50 : vector<4x8x8xf32> to vector<4x8x8xbf16>
    "tpu.trace_start"() <{level = 10 : i32, message = "hqk,hkd->hqd"}> : () -> ()
    %cst_27 = arith.constant dense<0.000000e+00> : vector<4x8x8xf32>
    %71 = tpu.matmul %69, %70, %cst_27 {dimension_numbers = #tpu.dot_dimension_numbers<[2], [1], [1], [2], [0, 0, 0, 1, 1, 2], [0], [0]>} : vector<4x8x8xbf16>, vector<4x8x8xbf16>, vector<4x8x8xf32> -> vector<4x8x8xf32>
    "tpu.trace_stop"() : () -> ()
    %72 = arith.truncf %71 : vector<4x8x8xf32> to vector<4x8x8xbf16>
    %c0_28 = arith.constant 0 : index
    %c0_29 = arith.constant 0 : index
    %c0_30 = arith.constant 0 : index
    %73 = vector.load %arg7[%c0_28, %c0_29, %c0_30] : memref<4x8x32xbf16, #tpu.memory_space<vmem>>, vector<4x8x32xbf16>
    "tpu.trace_start"() <{level = 10 : i32, message = "hsf,hfd->hsd"}> : () -> ()
    %cst_31 = arith.constant dense<0.000000e+00> : vector<4x8x32xf32>
    %74 = tpu.matmul %72, %73, %cst_31 {dimension_numbers = #tpu.dot_dimension_numbers<[2], [1], [1], [2], [0, 0, 0, 1, 1, 2], [0], [0]>} : vector<4x8x8xbf16>, vector<4x8x32xbf16>, vector<4x8x32xf32> -> vector<4x8x32xf32>
    "tpu.trace_stop"() : () -> ()
    %cst_32 = arith.constant dense<0.000000e+00> : vector<8x32xf32>
    %75 = vector.multi_reduction <add>, %74, %cst_32 [0] : vector<4x8x32xf32> to vector<8x32xf32>
    %c0_33 = arith.constant 0 : index
    %c0_34 = arith.constant 0 : index
    %76 = vector.load %arg8[%c0_33, %c0_34] : memref<1x32xf32, #tpu.memory_space<vmem>>, vector<1x32xf32>
    %77 = vector.broadcast %76 : vector<1x32xf32> to vector<8x32xf32>
    %78 = arith.addf %75, %77 : vector<8x32xf32>
    %79 = arith.addf %1, %78 : vector<8x32xf32>
    %c0_35 = arith.constant 0 : index
    %c0_36 = arith.constant 0 : index
    %80 = vector.load %arg9[%c0_35, %c0_36] : memref<1x32xf32, #tpu.memory_space<vmem>>, vector<1x32xf32>
    %c0_37 = arith.constant 0 : index
    %c0_38 = arith.constant 0 : index
    %81 = vector.load %arg10[%c0_37, %c0_38] : memref<1x32xf32, #tpu.memory_space<vmem>>, vector<1x32xf32>
    %cst_39 = arith.constant dense<0.000000e+00> : vector<8xf32>
    %82 = vector.multi_reduction <add>, %79, %cst_39 [1] : vector<8x32xf32> to vector<8xf32>
    %83 = vector.shape_cast %82 : vector<8xf32> to vector<8x1xf32>
    %cst_40 = arith.constant 3.200000e+01 : f32
    %84 = vector.broadcast %cst_40 : f32 to vector<8x1xf32>
    %85 = arith.divf %83, %84 : vector<8x1xf32>
    %86 = vector.broadcast %85 : vector<8x1xf32> to vector<8x32xf32>
    %87 = arith.subf %79, %86 : vector<8x32xf32>
    %88 = arith.mulf %87, %87 : vector<8x32xf32>
    %cst_41 = arith.constant dense<0.000000e+00> : vector<8xf32>
    %89 = vector.multi_reduction <add>, %88, %cst_41 [1] : vector<8x32xf32> to vector<8xf32>
    %90 = vector.shape_cast %89 : vector<8xf32> to vector<8x1xf32>
    %cst_42 = arith.constant 3.200000e+01 : f32
    %91 = vector.broadcast %cst_42 : f32 to vector<8x1xf32>
    %92 = arith.divf %90, %91 : vector<8x1xf32>
    %93 = vector.broadcast %85 : vector<8x1xf32> to vector<8x32xf32>
    %94 = arith.subf %79, %93 : vector<8x32xf32>
    %cst_43 = arith.constant 9.99999974E-6 : f32
    %95 = vector.broadcast %cst_43 : f32 to vector<8x1xf32>
    %96 = arith.addf %92, %95 : vector<8x1xf32>
    %97 = math.rsqrt %96 : vector<8x1xf32>
    %98 = vector.broadcast %97 : vector<8x1xf32> to vector<8x32xf32>
    %99 = arith.mulf %94, %98 : vector<8x32xf32>
    %100 = vector.broadcast %80 : vector<1x32xf32> to vector<8x32xf32>
    %101 = arith.mulf %99, %100 : vector<8x32xf32>
    %102 = vector.broadcast %81 : vector<1x32xf32> to vector<8x32xf32>
    %103 = arith.addf %101, %102 : vector<8x32xf32>
    %104 = arith.truncf %103 : vector<8x32xf32> to vector<8x32xbf16>
    %c0_44 = arith.constant 0 : index
    %c0_45 = arith.constant 0 : index
    %105 = vector.load %arg11[%c0_44, %c0_45] : memref<32x128xbf16, #tpu.memory_space<vmem>>, vector<32x128xbf16>
    %cst_46 = arith.constant dense<0.000000e+00> : vector<8x128xf32>
    %106 = tpu.matmul %104, %105, %cst_46 {dimension_numbers = #tpu.dot_dimension_numbers<[1], [0], [0], [1], [0, 0, 1, 1], [], []>} : vector<8x32xbf16>, vector<32x128xbf16>, vector<8x128xf32> -> vector<8x128xf32>
    %c0_47 = arith.constant 0 : index
    %c0_48 = arith.constant 0 : index
    %107 = vector.load %arg12[%c0_47, %c0_48] : memref<1x128xf32, #tpu.memory_space<vmem>>, vector<1x128xf32>
    %108 = vector.broadcast %107 : vector<1x128xf32> to vector<8x128xf32>
    %109 = arith.addf %106, %108 : vector<8x128xf32>
    %110 = arith.negf %109 : vector<8x128xf32>
    %111 = math.exp %110 : vector<8x128xf32>
    %cst_49 = arith.constant 1.000000e+00 : f32
    %112 = vector.broadcast %cst_49 : f32 to vector<8x128xf32>
    %113 = arith.addf %112, %111 : vector<8x128xf32>
    %114 = arith.divf %112, %113 : vector<8x128xf32>
    %115 = arith.mulf %109, %114 : vector<8x128xf32>
    %116 = arith.truncf %115 : vector<8x128xf32> to vector<8x128xbf16>
    %c0_50 = arith.constant 0 : index
    %c0_51 = arith.constant 0 : index
    %117 = vector.load %arg13[%c0_50, %c0_51] : memref<128x32xbf16, #tpu.memory_space<vmem>>, vector<128x32xbf16>
    %cst_52 = arith.constant dense<0.000000e+00> : vector<8x32xf32>
    %118 = tpu.matmul %116, %117, %cst_52 {dimension_numbers = #tpu.dot_dimension_numbers<[1], [0], [0], [1], [0, 0, 1, 1], [], []>} : vector<8x128xbf16>, vector<128x32xbf16>, vector<8x32xf32> -> vector<8x32xf32>
    %c0_53 = arith.constant 0 : index
    %c0_54 = arith.constant 0 : index
    %119 = vector.load %arg14[%c0_53, %c0_54] : memref<1x32xf32, #tpu.memory_space<vmem>>, vector<1x32xf32>
    %120 = vector.broadcast %119 : vector<1x32xf32> to vector<8x32xf32>
    %121 = arith.addf %118, %120 : vector<8x32xf32>
    %122 = arith.addf %79, %121 : vector<8x32xf32>
    %c0_55 = arith.constant 0 : index
    %c0_56 = arith.constant 0 : index
    %c0_57 = arith.constant 0 : index
    %123 = vector.load %arg15[%c0_55, %c0_56, %c0_57] : memref<1x8x32xf32, #tpu.memory_space<vmem>>, vector<1x8x32xf32>
    %124 = vector.shape_cast %123 : vector<1x8x32xf32> to vector<8x32xf32>
    %125 = vector.shape_cast %122 : vector<8x32xf32> to vector<1x8x32xf32>
    tpu.vector_store %arg15[%c0_55, %c0_56, %c0_57], %125 {strides = array<i32>} : memref<1x8x32xf32, #tpu.memory_space<vmem>>, vector<1x8x32xf32>,
    %126 = arith.truncf %49 : vector<4x8x8xf32> to vector<4x8x8xbf16>
    %c0_58 = arith.constant 0 : index
    %c0_59 = arith.constant 0 : index
    %c0_60 = arith.constant 0 : index
    %c0_61 = arith.constant 0 : index
    %127 = vector.load %arg16[%c0_58, %c0_59, %c0_60, %c0_61] : memref<1x4x8x8xbf16, #tpu.memory_space<vmem>>, vector<1x4x8x8xbf16>
    %128 = vector.shape_cast %127 : vector<1x4x8x8xbf16> to vector<4x8x8xbf16>
    %129 = vector.shape_cast %126 : vector<4x8x8xbf16> to vector<1x4x8x8xbf16>
    tpu.vector_store %arg16[%c0_58, %c0_59, %c0_60, %c0_61], %129 {strides = array<i32>} : memref<1x4x8x8xbf16, #tpu.memory_space<vmem>>, vector<1x4x8x8xbf16>,
    %130 = arith.truncf %50 : vector<4x8x8xf32> to vector<4x8x8xbf16>
    %c0_62 = arith.constant 0 : index
    %c0_63 = arith.constant 0 : index
    %c0_64 = arith.constant 0 : index
    %c0_65 = arith.constant 0 : index
    %131 = vector.load %arg17[%c0_62, %c0_63, %c0_64, %c0_65] : memref<1x4x8x8xbf16, #tpu.memory_space<vmem>>, vector<1x4x8x8xbf16>
    %132 = vector.shape_cast %131 : vector<1x4x8x8xbf16> to vector<4x8x8xbf16>
    %133 = vector.shape_cast %130 : vector<4x8x8xbf16> to vector<1x4x8x8xbf16>
    tpu.vector_store %arg17[%c0_62, %c0_63, %c0_64, %c0_65], %133 {strides = array<i32>} : memref<1x4x8x8xbf16, #tpu.memory_space<vmem>>, vector<1x4x8x8xbf16>,
    return
  }
  func.func @transform_0(%arg0: i32) -> (i32, i32, i32) {
    %c0_i32 = arith.constant 0 : i32
    %c0_i32_0 = arith.constant 0 : i32
    %c0_i32_1 = arith.constant 0 : i32
    return %arg0, %c0_i32, %c0_i32_0 : i32, i32, i32
  }
  func.func @transform_1(%arg0: i32) -> (i32, i32, i32) {
    %c0_i32 = arith.constant 0 : i32
    %c0_i32_0 = arith.constant 0 : i32
    %c0_i32_1 = arith.constant 0 : i32
    return %arg0, %c0_i32, %c0_i32_0 : i32, i32, i32
  }
  func.func @transform_2(%arg0: i32) -> (i32, i32) {
    %c0_i32 = arith.constant 0 : i32
    %c0_i32_0 = arith.constant 0 : i32
    %c0_i32_1 = arith.constant 0 : i32
    return %c0_i32, %c0_i32_0 : i32, i32
  }
  func.func @transform_3(%arg0: i32) -> (i32, i32) {
    %c0_i32 = arith.constant 0 : i32
    %c0_i32_0 = arith.constant 0 : i32
    %c0_i32_1 = arith.constant 0 : i32
    return %c0_i32, %c0_i32_0 : i32, i32
  }
  func.func @transform_4(%arg0: i32) -> (i32, i32, i32) {
    %c0_i32 = arith.constant 0 : i32
    %c0_i32_0 = arith.constant 0 : i32
    %c0_i32_1 = arith.constant 0 : i32
    %c0_i32_2 = arith.constant 0 : i32
    return %c0_i32, %c0_i32_0, %c0_i32_1 : i32, i32, i32
  }
  func.func @transform_5(%arg0: i32) -> (i32, i32, i32) {
    %c0_i32 = arith.constant 0 : i32
    %c0_i32_0 = arith.constant 0 : i32
    %c0_i32_1 = arith.constant 0 : i32
    %c0_i32_2 = arith.constant 0 : i32
    return %c0_i32, %c0_i32_0, %c0_i32_1 : i32, i32, i32
  }
  func.func @transform_6(%arg0: i32) -> (i32, i32, i32) {
    %c0_i32 = arith.constant 0 : i32
    %c0_i32_0 = arith.constant 0 : i32
    %c0_i32_1 = arith.constant 0 : i32
    %c0_i32_2 = arith.constant 0 : i32
    return %c0_i32, %c0_i32_0, %c0_i32_1 : i32, i32, i32
  }
  func.func @transform_7(%arg0: i32) -> (i32, i32) {
    %c0_i32 = arith.constant 0 : i32
    %c0_i32_0 = arith.constant 0 : i32
    %c0_i32_1 = arith.constant 0 : i32
    return %c0_i32, %c0_i32_0 : i32, i32
  }
  func.func @transform_8(%arg0: i32) -> (i32, i32) {
    %c0_i32 = arith.constant 0 : i32
    %c0_i32_0 = arith.constant 0 : i32
    %c0_i32_1 = arith.constant 0 : i32
    return %c0_i32, %c0_i32_0 : i32, i32
  }
  func.func @transform_9(%arg0: i32) -> (i32, i32) {
    %c0_i32 = arith.constant 0 : i32
    %c0_i32_0 = arith.constant 0 : i32
    %c0_i32_1 = arith.constant 0 : i32
    return %c0_i32, %c0_i32_0 : i32, i32
  }
  func.func @transform_10(%arg0: i32) -> (i32, i32) {
    %c0_i32 = arith.constant 0 : i32
    %c0_i32_0 = arith.constant 0 : i32
    %c0_i32_1 = arith.constant 0 : i32
    return %c0_i32, %c0_i32_0 : i32, i32
  }
  func.func @transform_11(%arg0: i32) -> (i32, i32) {
    %c0_i32 = arith.constant 0 : i32
    %c0_i32_0 = arith.constant 0 : i32
    %c0_i32_1 = arith.constant 0 : i32
    return %c0_i32, %c0_i32_0 : i32, i32
  }
  func.func @transform_12(%arg0: i32) -> (i32, i32) {
    %c0_i32 = arith.constant 0 : i32
    %c0_i32_0 = arith.constant 0 : i32
    %c0_i32_1 = arith.constant 0 : i32
    return %c0_i32, %c0_i32_0 : i32, i32
  }
  func.func @transform_13(%arg0: i32) -> (i32, i32) {
    %c0_i32 = arith.constant 0 : i32
    %c0_i32_0 = arith.constant 0 : i32
    %c0_i32_1 = arith.constant 0 : i32
    return %c0_i32, %c0_i32_0 : i32, i32
  }
  func.func @transform_14(%arg0: i32) -> (i32, i32, i32) {
    %c0_i32 = arith.constant 0 : i32
    %c0_i32_0 = arith.constant 0 : i32
    %c0_i32_1 = arith.constant 0 : i32
    return %arg0, %c0_i32, %c0_i32_0 : i32, i32, i32
  }
  func.func @transform_15(%arg0: i32) -> (i32, i32, i32, i32) {
    %c0_i32 = arith.constant 0 : i32
    %c0_i32_0 = arith.constant 0 : i32
    %c0_i32_1 = arith.constant 0 : i32
    %c0_i32_2 = arith.constant 0 : i32
    return %arg0, %c0_i32, %c0_i32_0, %c0_i32_1 : i32, i32, i32, i32
  }
  func.func @transform_16(%arg0: i32) -> (i32, i32, i32, i32) {
    %c0_i32 = arith.constant 0 : i32
    %c0_i32_0 = arith.constant 0 : i32
    %c0_i32_1 = arith.constant 0 : i32
    %c0_i32_2 = arith.constant 0 : i32
    return %arg0, %c0_i32, %c0_i32_0, %c0_i32_1 : i32, i32, i32, i32
  }
}

</mosaic_0001>

<bundles_post_ra>
// kernel: tpu_custom_call.1
= control target key start
LH: loop header
LB: loop body
LE: loop exit
PB: predicated region body
PF: predicated region fallthrough
CT: control target
= control target key end

     0   :  { %s3672_s0 = inlined_call_operand.vmem [shape: f32[2,8,32], index: 0, kind: input, shape index: {}]   ;;  %s3673_s1 = inlined_call_operand.vmem [shape: f32[2,1,8], index: 1, kind: input, shape index: {}]   ;;  %s3674_s2 = inlined_call_operand.vmem [shape: f32[1,32], index: 2, kind: input, shape index: {}]   ;;  %s3675_s3 = inlined_call_operand.vmem [shape: f32[1,32], index: 3, kind: input, shape index: {}]   ;;  %s3676_s4 = inlined_call_operand.vmem [shape: bf16[12,32,8], index: 4, kind: input, shape index: {}]   ;;  %s3677_s5 = inlined_call_operand.vmem [shape: f32[12,1,8], index: 5, kind: input, shape index: {}]   ;;  %s3678_s6 = inlined_call_operand.vmem [shape: bf16[4,8,32], index: 6, kind: input, shape index: {}]   ;;  %s3679_s7 = inlined_call_operand.vmem [shape: f32[1,32], index: 7, kind: input, shape index: {}]   ;;  %s3680_s8 = inlined_call_operand.vmem [shape: f32[1,32], index: 8, kind: input, shape index: {}]   ;;  %s3681_s9 = inlined_call_operand.vmem [shape: f32[1,32], index: 9, kind: input, shape index: {}]   ;;  %s3682_s10 = inlined_call_operand.vmem [shape: bf16[32,128], index: 10, kind: input, shape index: {}]   ;;  %s3683_s11 = inlined_call_operand.vmem [shape: f32[1,128], index: 11, kind: input, shape index: {}]   ;;  %s3684_s12 = inlined_call_operand.vmem [shape: bf16[128,32], index: 12, kind: input, shape index: {}]   ;;  %s3685_s13 = inlined_call_operand.vmem [shape: f32[1,32], index: 13, kind: input, shape index: {}]   ;;  %s3686_s14 = inlined_call_operand.hbm [shape: f32[2,8,32], index: 14, kind: output, shape index: {0}]   ;;  %s3687_s15 = inlined_call_operand.hbm [shape: bf16[2,4,8,8], index: 15, kind: output, shape index: {1}]   ;;  %s3688_s16 = inlined_call_operand.hbm [shape: bf16[2,4,8,8], index: 16, kind: output, shape index: {2}]  }
   0x1   :  { %3696 = sst [smem:[#allocation12_spill]] %s3672_s0 }
   0x2   :  { %3697 = sst [smem:[#allocation13_spill]] %s3673_s1 }
   0x3   :  { %3698 = sst [smem:[#allocation14_spill]] %s3674_s2 }
   0x4   :  { %3699 = sst [smem:[#allocation15_spill]] %s3675_s3 }
   0x5   :  { %3700 = sst [smem:[#allocation16_spill]] %s3676_s4 }
   0x6   :  { %3701 = sst [smem:[#allocation17_spill]] %s3677_s5 }
   0x7   :  { %3702 = sst [smem:[#allocation18_spill]] %s3678_s6 }
   0x8   :  { %22 = vsyncpa [#allocation3], 0 }
   0x9   :  { %24 = vsyncpa [#allocation3 + $0x1], 0 }
   0xa   :  { %25 = vsyncpa [#allocation5], 0 }
   0xb   :  { %27 = vsyncpa [#allocation5 + $0x1], 0  ;;  %s3103_s21 = smov 0   ;;  %s3105_s22 = smov 0  }
   0xc   :  { %s3107_s23 = smov 0   ;;  %s3109_s24 = smov 0  }
   0xd LB: > { %3703 = sst [smem:[#allocation9_spill]] %s3005_s23  ;;  %s3124_s25 = sadd.s32 4294967295, %s3009_s24   ;;  %s3009_s24 = sphi %s3109_s24, %s3720_s24   ;;  %s3005_s23 = sphi %s3107_s23, %s3722_s23   ;;  %s3001_s22 = sphi %s3105_s22, %s3724_s22   ;;  %s2997_s21 = sphi %s3103_s21, %s3723_s21  }
   0xe   : > { %s3689_s26 = sadd.s32 4294967294, %s3009_s24   ;;  %s3128_s27 = sadd.s32 1, %s3009_s24  }
   0xf   : > { %3704 = sst [smem:[#allocation10_spill]] %s3128_s27  ;;  %s344_s28 = sadd.s32 1, %s3005_s23 }
  0x10   : > { %s341_s29 = ssub.s32 %s3009_s24, %s3128_s27  ;;  %p354_p0 = scmp.ne.s32.totalorder %s3005_s23, %s3001_s22 }
  0x11   : > { %p342_p1 = scmp.eq.s32.totalorder %s341_s29, 0  ;;  %p355_p2 = scmp.eq.s32.totalorder %s3124_s25, 1 }
  0x12   : > { %p360_p3 = scmp.ne.s32.totalorder %s3001_s22, %s2997_s21  ;;  %p361_p4 = scmp.eq.s32.totalorder %s3689_s26, 1 }
  0x13   : > { %s3141_s30 = scalar_select %p342_p1, %s3005_s23, %s344_s28  }
  0x14   : > { %p3143_p5 = por %p355_p2, %p354_p0  ;;  %p3147_p6 = por %p361_p4, %p360_p3 }
  0x15   : > { %3705 = sst [smem:[#allocation11_spill]] %s3141_s30  ;;  %p2417_p7 = scmp.ge.s32.totalorder %s3009_s24, 1 }
  0x16   : > { %p480_p8 = scmp.lt.s32.totalorder %s3009_s24, 3 }
  0x18   : > { %p481_p9 = pnand %p2417_p7, %p480_p8 }
  0x19   : > { %p542_p10 = scmp.lt.s32.totalorder (!%p481_p9), %s3124_s25, 1  ;;  %s3708_s29 = sld [smem:[#allocation12_spill]] (!%p481_p9) }
  0x1a   : > { %484 = sbr.rel (%p481_p9) target bundleno = 2245 (0x8c5), region = 76  ;;  %s3709_s4 = sld [smem:[#allocation16_spill]] (!%p481_p9) }
  0x1b   : > { %s3710_s2 = sld [smem:[#allocation14_spill]] (!%p481_p9)  ;;  %s3328_s27 = sand.u32 (!%p481_p9), 1, %s3001_s22  }
  0x1c   : > { %s3711_s3 = sld [smem:[#allocation15_spill]] (!%p481_p9)  ;;  %s3693_s30 = sshll.u32 (!%p481_p9), %s3328_s27, 4 }
  0x1d   : > { %s3712_s5 = sld [smem:[#allocation17_spill]] (!%p481_p9)  ;;  %s3694_s28 = sshll.u32 (!%p481_p9), %s3124_s25, 8 }
  0x1e   : > { %s3714_s1 = sld [smem:[#allocation13_spill]] (!%p481_p9)  ;;  %s3561_s23 = scalar_lea.hbm (!%p481_p9), %s3687_s15, %s3694_s28 }
  0x1f   : > { %s3155_s18 = scalar_select %p542_p10, %s3124_s25, 1  ;;  %vm568_vm0 = vcmask 261120   ;;  %v3011_v9 = vmov 0.0   ;;  %vm3012_vm1 = vmmov 0   ;;  %vm1365_vm2 = vcmask 64512  }
  0x20   : > { %v2835_v7 = vld [vmem:[%s3709_s4 + $0x8] sm:$0xff]   ;;  %v2836_v8 = vld [vmem:[%s3709_s4 + $0x38] sm:$0xff]   ;;  %2586 = vmatprep.subr.bf16.mxu0 %v3011_v9  ;;  %2610 = vmatprep.subr.bf16.mxu1 %v3011_v9  ;;  %v2837_v10 = vld [vmem:[%s3709_s4] sm:$0xff]   ;;  %vm2220_vm3 = vcmask 60416   ;;  %vm1613_vm4 = vcmask 1043456   ;;  %s3715_s6 = sld [smem:[#allocation18_spill]] }
  0x21   : > { %s2421_s19 = sshll.u32 %s3155_s18, 3  ;;  %2587 = vmatpush3.bf16.msra.mxu0 %v2835_v7  ;;  %2611 = vmatpush3.bf16.msra.mxu1 %v2836_v8  ;;  %v2838_v11 = vld [vmem:[%s3709_s4 + $0x30] sm:$0xff]   ;;  %v2423_v16 = vld [vmem:[%s3710_s2] ss:$0 sm:$0xff]  ;;  %v2839_v21 = vld [vmem:[%s3709_s4 + $0x18] sm:$0xff]  }
  0x22   : > { %s545_s26 = scalar_lea.vmem %s3708_s29, %s2421_s19  ;;  %2588 = vmatprep.subr.bf16.mxu0 %v3011_v9  ;;  %2612 = vmatprep.subr.bf16.mxu1 %v3011_v9  ;;  %v2424_v18 = vld [vmem:[%s3711_s3] ss:$0 sm:$0xff]  ;;  %v2840_v22 = vld [vmem:[%s3709_s4 + $0x58] sm:$0xff]   ;;  %v2841_v24 = vld [vmem:[%s3709_s4 + $0x10] sm:$0xff]   ;;  %s3340_s19 = scalar_lea.vmem [#allocation4], %s3693_s30 }
  0x23   : > { %v3161_v0 = vld [vmem:[%s545_s26] sm:$0xff]  ;;  %2590 = vmatprep.mubr.msk.bf16.mxu0 %vm3012_vm1, %v3011_v9  ;;  %2614 = vmatprep.mubr.msk.bf16.mxu1 %vm3012_vm1, %v3011_v9  ;;  %v2842_v25 = vld [vmem:[%s3709_s4 + $0x50] sm:$0xff]   ;;  %v2843_v26 = vld [vmem:[%s3709_s4 + $0x28] sm:$0xff]   ;;  %s3713_s29 = sshll.u32 %s3328_s27, 4  ;;  %s2266_s2 = sshll.u32 %s3340_s19, 4  ;;  %s3551_s2 = int_to_ptr.vmem [resolvable:$true] %s2266_s2 }
  0x24   : > { %v569_v1 = vsel %vm568_vm0, %v3161_v0, 0.0  ;;  %v2844_v27 = vld [vmem:[%s3709_s4 + $0x78] sm:$0xff]   ;;  %v2845_v28 = vld [vmem:[%s3709_s4 + $0x20] sm:$0xff]   ;;  %v2846_v29 = vld [vmem:[%s3709_s4 + $0x70] sm:$0xff]   ;;  %s3375_s20 = scalar_lea.vmem [#allocation6], %s3713_s29  ;;  %s548_s30 = scalar_lea.vmem %s3714_s1, %s3155_s18 }
  0x25   : > { %570 = vadd.xlane.f32.xlu0 %v569_v1  ;;  %2589 = vmatpush3.bf16.msra.mxu0 %v2837_v10  ;;  %v2847_v30 = vld [vmem:[%s3709_s4 + $0x48] sm:$0xff]   ;;  %v2848_v31 = vld [vmem:[%s3709_s4 + $0x98] sm:$0xff]   ;;  %v2849_v32 = vld [vmem:[%s3709_s4 + $0x40] sm:$0xff]   ;;  %s2234_s26 = sand.u32 1, %s3124_s25   ;;  %s2893_s3 = scalar_lea.vmem %s3551_s2, 256 }
  0x26   : > { %2613 = vmatpush3.bf16.msra.mxu1 %v2838_v11  ;;  %2594 = vmatprep.subr.bf16.mxu0 %v3011_v9  ;;  %v2850_v33 = vld [vmem:[%s3709_s4 + $0x90] sm:$0xff]   ;;  %v2851_v34 = vld [vmem:[%s3709_s4 + $0x68] sm:$0xff]   ;;  %v2852_v35 = vld [vmem:[%s3709_s4 + $0xb8] sm:$0xff]   ;;  %s3563_s1 = scalar_lea.sflag [#allocation5], %s2234_s26  ;;  %p2894_p11 = scmp.ne.s32.totalorder %s3551_s2, %s2893_s3 }
  0x27   : > { %2626 = vmatprep.subr.bf16.mxu1 %v3011_v9  ;;  %v2853_v36 = vld [vmem:[%s3709_s4 + $0x60] sm:$0xff]   ;;  %v2854_v37 = vld [vmem:[%s3709_s4 + $0xb0] sm:$0xff]   ;;  %v2855_v38 = vld [vmem:[%s3709_s4 + $0x88] sm:$0xff]  }
  0x28   : > { %v2856_v39 = vld [vmem:[%s3709_s4 + $0x80] sm:$0xff]   ;;  %v2857_v40 = vld [vmem:[%s3709_s4 + $0xa8] sm:$0xff]   ;;  %p2895_p12 = pnand %p2894_p11, %p3143_p5 }
  0x29   : > { %v2858_v41 = vld [vmem:[%s3709_s4 + $0xa0] sm:$0xff]  }
  0x2a   : > { %v2430_v50 = vld [vmem:[%s3712_s5 + $0x5] ss:$0 sm:$0xff]  ;;  %v2426_v57 = vld [vmem:[%s3712_s5 + $0x1] ss:$0 sm:$0xff]  ;;  %v2432_v63 = vld [vmem:[%s3712_s5 + $0x7] ss:$0 sm:$0xff]  ;;  %p2896_p13 = pneg %p2895_p12 }
  0x2b   : > { %v2428_v10 = vld [vmem:[%s3712_s5 + $0x3] ss:$0 sm:$0xff] }
  0xae   : > { %v571_v2 = vpop.xlane.xlu0 %570 }
  0xaf   : > { %v573_v3 = vmul.f32 0.03125, %v571_v2 }
  0xb1   : > { %v574_v4 = vsub.f32 %v3161_v0, %v573_v3 }
  0xb3   : > { %v575_v5 = vmul.f32 %v574_v4, %v574_v4 }
  0xb5   : > { %v576_v6 = vsel %vm568_vm0, %v575_v5, 0.0 }
  0xb6   : > { %577 = vadd.xlane.f32.xlu0 %v576_v6 }
 0x13f   : > { %v578_v12 = vpop.xlane.xlu0 %577 }
 0x140   : > { %v579_v13 = vmul.f32 0.03125, %v578_v12 }
 0x142   : > { %v580_v14 = vadd.f32 1e-05, %v579_v13 }
 0x144   : > { %2869 = vrsqrt.f32 %v580_v14 }
 0x151   : > { %v2870_v15 = vpop.eup %2869 }
 0x152   : > { %v582_v17 = vmul.f32 %v2870_v15, %v574_v4 }
 0x154   : > { %v589_v19 = vmul.f32 %v2423_v16, %v582_v17  ;;  %v2429_v16 = vld [vmem:[%s3712_s5 + $0x4] ss:$0 sm:$0xff]  ;;  %v2434_v17 = vld [vmem:[%s3712_s5 + $0x9] ss:$0 sm:$0xff] }
 0x156   : > { %v596_v20 = vadd.f32 %v2424_v18, %v589_v19 }
 0x158   : > { %v3201_v23 = vpack.c.bf16 %v596_v20, %v596_v20 }
 0x15a   : > { %2591 = vmatmul.mubr.msk.bf16.vlgmr.msra.gmra.mxu0 %vm568_vm0, %v3201_v23  ;;  %2615 = vmatmul.mubr.msk.bf16.vlgmr.msra.gmra.mxu1 %vm568_vm0, %v3201_v23 }
 0x15b   : > { %2595 = vmatpush3.bf16.msra.mxu0 %v2839_v21  ;;  %2627 = vmatpush3.bf16.msra.mxu1 %v2840_v22 }
 0x15c   : > { %2596 = vmatprep.subr.bf16.mxu0 %v3011_v9  ;;  %2628 = vmatprep.subr.bf16.mxu1 %v3011_v9 }
 0x15d   : > { %2598 = vmatprep.mubr.msk.bf16.mxu0 %vm3012_vm1, %v3011_v9  ;;  %2630 = vmatprep.mubr.msk.bf16.mxu1 %vm3012_vm1, %v3011_v9 }
 0x15f   : > { %2597 = vmatpush3.bf16.msra.mxu0 %v2841_v24  ;;  %2629 = vmatpush3.bf16.msra.mxu1 %v2842_v25 }
 0x160   : > { %2602 = vmatprep.subr.bf16.mxu0 %v3011_v9  ;;  %2642 = vmatprep.subr.bf16.mxu1 %v3011_v9 }
 0x162   : > { %2599 = vmatmul.mubr.msk.bf16.vlgmr.msra.gmra.mxu0 %vm568_vm0, %v3201_v23  ;;  %2631 = vmatmul.mubr.msk.bf16.vlgmr.msra.gmra.mxu1 %vm568_vm0, %v3201_v23 }
 0x163   : > { %2603 = vmatpush3.bf16.msra.mxu0 %v2843_v26  ;;  %2643 = vmatpush3.bf16.msra.mxu1 %v2844_v27 }
 0x164   : > { %2604 = vmatprep.subr.bf16.mxu0 %v3011_v9  ;;  %2644 = vmatprep.subr.bf16.mxu1 %v3011_v9 }
 0x165   : > { %2606 = vmatprep.mubr.msk.bf16.mxu0 %vm3012_vm1, %v3011_v9  ;;  %2646 = vmatprep.mubr.msk.bf16.mxu1 %vm3012_vm1, %v3011_v9 }
 0x167   : > { %2605 = vmatpush3.bf16.msra.mxu0 %v2845_v28  ;;  %2645 = vmatpush3.bf16.msra.mxu1 %v2846_v29  ;;  %v2425_v28 = vld [vmem:[%s3712_s5] ss:$0 sm:$0xff] }
 0x168   : > { %2618 = vmatprep.subr.bf16.mxu0 %v3011_v9  ;;  %2658 = vmatprep.subr.bf16.mxu1 %v3011_v9 }
 0x16a   : > { %2607 = vmatmul.mubr.msk.bf16.vlgmr.msra.gmra.mxu0 %vm568_vm0, %v3201_v23  ;;  %2647 = vmatmul.mubr.msk.bf16.vlgmr.msra.gmra.mxu1 %vm568_vm0, %v3201_v23 }
 0x16b   : > { %2619 = vmatpush3.bf16.msra.mxu0 %v2847_v30  ;;  %2659 = vmatpush3.bf16.msra.mxu1 %v2848_v31 }
 0x16c   : > { %2620 = vmatprep.subr.bf16.mxu0 %v3011_v9  ;;  %2660 = vmatprep.subr.bf16.mxu1 %v3011_v9 }
 0x16d   : > { %2622 = vmatprep.mubr.msk.bf16.mxu0 %vm3012_vm1, %v3011_v9  ;;  %2662 = vmatprep.mubr.msk.bf16.mxu1 %vm3012_vm1, %v3011_v9 }
 0x16f   : > { %2621 = vmatpush3.bf16.msra.mxu0 %v2849_v32  ;;  %2661 = vmatpush3.bf16.msra.mxu1 %v2850_v33 }
 0x170   : > { %2634 = vmatprep.subr.bf16.mxu0 %v3011_v9  ;;  %2674 = vmatprep.subr.bf16.mxu1 %v3011_v9 }
 0x172   : > { %2623 = vmatmul.mubr.msk.bf16.vlgmr.msra.gmra.mxu0 %vm568_vm0, %v3201_v23  ;;  %2663 = vmatmul.mubr.msk.bf16.vlgmr.msra.gmra.mxu1 %vm568_vm0, %v3201_v23 }
 0x173   : > { %2635 = vmatpush3.bf16.msra.mxu0 %v2851_v34  ;;  %2675 = vmatpush3.bf16.msra.mxu1 %v2852_v35  ;;  %v2431_v35 = vld [vmem:[%s3712_s5 + $0x6] ss:$0 sm:$0xff] }
 0x174   : > { %2636 = vmatprep.subr.bf16.mxu0 %v3011_v9  ;;  %2676 = vmatprep.subr.bf16.mxu1 %v3011_v9 }
 0x175   : > { %2638 = vmatprep.mubr.msk.bf16.mxu0 %vm3012_vm1, %v3011_v9  ;;  %2678 = vmatprep.mubr.msk.bf16.mxu1 %vm3012_vm1, %v3011_v9 }
 0x177   : > { %2637 = vmatpush3.bf16.msra.mxu0 %v2853_v36  ;;  %2677 = vmatpush3.bf16.msra.mxu1 %v2854_v37  ;;  %v2436_v36 = vld [vmem:[%s3712_s5 + $0xb] ss:$0 sm:$0xff] }
 0x178   : > { %2650 = vmatprep.subr.bf16.mxu0 %v3011_v9  ;;  %2688 = vmatprep.subr.bf16.mxu1 %v3011_v9 }
 0x17a   : > { %2639 = vmatmul.mubr.msk.bf16.vlgmr.msra.gmra.mxu0 %vm568_vm0, %v3201_v23  ;;  %2679 = vmatmul.mubr.msk.bf16.vlgmr.msra.gmra.mxu1 %vm568_vm0, %v3201_v23 }
 0x17b   : > { %2651 = vmatpush3.bf16.msra.mxu0 %v2855_v38  ;;  %2654 = vmatprep.mubr.msk.bf16.mxu0 %vm3012_vm1, %v3011_v9 }
 0x17c   : > { %2652 = vmatprep.subr.bf16.mxu0 %v3011_v9  ;;  %2690 = vmatprep.mubr.msk.bf16.mxu1 %vm3012_vm1, %v3011_v9 }
 0x17f   : > { %2653 = vmatpush3.bf16.msra.mxu0 %v2856_v39 }
 0x180   : > { %2666 = vmatprep.subr.bf16.mxu0 %v3011_v9 }
 0x182   : > { %2655 = vmatmul.mubr.msk.bf16.vlgmr.msra.gmra.mxu0 %vm568_vm0, %v3201_v23 }
 0x183   : > { %2667 = vmatpush3.bf16.msra.mxu0 %v2857_v40  ;;  %2670 = vmatprep.mubr.msk.bf16.mxu0 %vm3012_vm1, %v3011_v9 }
 0x184   : > { %2668 = vmatprep.subr.bf16.mxu0 %v3011_v9 }
 0x187   : > { %2669 = vmatpush3.bf16.msra.mxu0 %v2858_v41 }
 0x188   : > { %2682 = vmatprep.subr.bf16.mxu0 %v3011_v9 }
 0x18a   : > { %2671 = vmatmul.mubr.msk.bf16.vlgmr.msra.gmra.mxu0 %vm568_vm0, %v3201_v23 }
 0x18b   : > { %2684 = vmatprep.mubr.msk.bf16.mxu0 %vm3012_vm1, %v3011_v9 }
 0x21a   : > { %v3325_v42 = vpop.f32.mrf.mxu0  ;;  %v935_v43 = vpop.f32.mrf.mxu1 }
 0x21b   : > { %v936_v18 = vadd.f32 %v2428_v10, %v935_v43  ;;  %v780_v37 = vadd.f32 %v2425_v28, %v3325_v42  ;;  %v2427_v42 = vld [vmem:[%s3712_s5 + $0x2] ss:$0 sm:$0xff] }
 0x21c   : > { %v2592_v44 = vpop.f32.mrf.mxu0  ;;  %v2616_v45 = vpop.f32.mrf.mxu1 }
 0x21d   : > { %v1360_v25 = vpack.c.bf16 %v936_v18, %v936_v18  ;;  %v1357_v45 = vpack.c.bf16 %v780_v37, %v780_v37 }
 0x21e   : > { %v782_v46 = vpop.f32.mrf.mxu0  ;;  %v938_v47 = vpop.f32.mrf.mxu1 }
 0x220   : > { %v2593_v48 = vpop.f32.mrf.mxu0  ;;  %v2617_v49 = vpop.f32.mrf.mxu1 }
 0x222   : > { %v831_v51 = vpop.f32.mrf.mxu0  ;;  %v1039_v52 = vpop.f32.mrf.mxu1 }
 0x223   : > { %v1040_v53 = vadd.f32 %v2430_v50, %v1039_v52  ;;  %v832_v1 = vadd.f32 %v2426_v57, %v831_v51 }
 0x224   : > { %v2600_v54 = vpop.f32.mrf.mxu0  ;;  %v2632_v55 = vpop.f32.mrf.mxu1 }
 0x225   : > { %v1362_v56 = vpack.c.bf16 %v1040_v53, %v1040_v53  ;;  %v1358_v7 = vpack.c.bf16 %v832_v1, %v832_v1  ;;  %v2433_v53 = vld [vmem:[%s3712_s5 + $0x8] ss:$0 sm:$0xff] }
 0x226   : > { %v834_v58 = vpop.f32.mrf.mxu0  ;;  %v1042_v59 = vpop.f32.mrf.mxu1 }
 0x227   : > { %v1416_v60 = vsel %vm1365_vm2, %v1362_v56, 0  ;;  %2222 = vst.msk [vmem:[%s3340_s19 + $0x4] sm:$0xf] %vm2220_vm3, %v1362_v56 }
 0x228   : > { %v2601_v61 = vpop.f32.mrf.mxu0  ;;  %v2633_v62 = vpop.f32.mrf.mxu1  ;;  %2689 = vmatpush3.bf16.xpose.msra.mxu1 %v1416_v60 }
 0x229   : > { %2700 = vmatprep.subr.bf16.mxu1 %v3011_v9 }
 0x22a   : > { %v3348_v2 = vpop.f32.mrf.mxu0  ;;  %v1143_v3 = vpop.f32.mrf.mxu1 }
 0x22b   : > { %v1144_v4 = vadd.f32 %v2432_v63, %v1143_v3  ;;  %v884_v54 = vadd.f32 %v2427_v42, %v3348_v2  ;;  %v2435_v63 = vld [vmem:[%s3712_s5 + $0xa] ss:$0 sm:$0xff] }
 0x22c   : > { %v2608_v5 = vpop.f32.mrf.mxu0  ;;  %v2648_v6 = vpop.f32.mrf.mxu1 }
 0x22d   : > { %v1364_v8 = vpack.c.bf16 %v1144_v4, %v1144_v4  ;;  %v1359_v58 = vpack.c.bf16 %v884_v54, %v884_v54 }
 0x22e   : > { %v886_v11 = vpop.f32.mrf.mxu0  ;;  %v1146_v12 = vpop.f32.mrf.mxu1 }
 0x22f   : > { %v1508_v13 = vsel %vm1365_vm2, %v1364_v8, 0  ;;  %2224 = vst.msk [vmem:[%s3340_s19 + $0xc] sm:$0xf] %vm2220_vm3, %v1364_v8  ;;  %2691 = vmatmul.mubr.msk.bf16.vlgmr.msra.gmra.mxu1 %vm1365_vm2, %v1358_v7  ;;  %v559_v11 = vlaneseq }
 0x230   : > { %v2609_v14 = vpop.f32.mrf.mxu0  ;;  %v2649_v15 = vpop.f32.mrf.mxu1  ;;  %2701 = vmatpush3.bf16.xpose.msra.mxu1 %v1508_v13  ;;  %2702 = vmatprep.mubr.msk.bf16.mxu1 %vm3012_vm1, %v3011_v9 }
 0x231   : > { %2712 = vmatprep.subr.bf16.mxu1 %v3011_v9  ;;  %v560_v14 = vshrl.u32 %v559_v11, 7  ;;  %v562_v15 = vand.u32 127, %v559_v11 }
 0x232   : > { %v987_v19 = vpop.f32.mrf.mxu0  ;;  %v1247_v20 = vpop.f32.mrf.mxu1 }
 0x233   : > { %v988_v21 = vadd.f32 %v2429_v16, %v987_v19  ;;  %v1248_v22 = vadd.f32 %v2434_v17, %v1247_v20  ;;  %v2422_v16 = vld [vmem:[%s548_s30] ss:$0 sm:$0xff]  ;;  %vm563_vm6 = vcmp.gt.s32.totalorder %v562_v15, %v560_v14 }
 0x234   : > { %v2624_v23 = vpop.f32.mrf.mxu0  ;;  %v2664_v24 = vpop.f32.mrf.mxu1  ;;  %vm558_vm5 = vcmp.gt.f32.partialorder %v2422_v16, 0.5 }
 0x235   : > { %v1361_v26 = vpack.c.bf16 %v988_v21, %v988_v21  ;;  %v1607_v27 = vpack.c.bf16 %v1248_v22, %v1248_v22  ;;  %vm564_vm7 = vmor %vm558_vm5, %vm563_vm6 }
 0x236   : > { %v990_v29 = vpop.f32.mrf.mxu0  ;;  %v1250_v30 = vpop.f32.mrf.mxu1  ;;  %v565_v24 = vsel %vm564_vm7, -10000.0, %v3011_v9 }
 0x237   : > { %v1370_v31 = vsel %vm1365_vm2, %v1361_v26, 0  ;;  %2221 = vst.msk [vmem:[%s3340_s19] sm:$0xf] %vm2220_vm3, %v1361_v26  ;;  %v1661_v32 = vsel %vm1613_vm4, %v1607_v27, 0  ;;  %2226 = vst.msk [vmem:[%s3375_s20 + $0x4] sm:$0xf] %vm2220_vm3, %v1607_v27  ;;  %2703 = vmatmul.mubr.msk.bf16.vlgmr.msra.gmra.mxu1 %vm1365_vm2, %v1360_v25 }
 0x238   : > { %v2625_v33 = vpop.f32.mrf.mxu0  ;;  %v2665_v34 = vpop.f32.mrf.mxu1  ;;  %2683 = vmatpush3.bf16.xpose.msra.mxu0 %v1370_v31  ;;  %2713 = vmatpush3.bf16.msra.mxu1 %v1661_v32 }
 0x239   : > { %2694 = vmatprep.subr.bf16.mxu0 %v3011_v9  ;;  %2714 = vmatprep.mubr.msk.bf16.mxu1 %vm3012_vm1, %v3011_v9 }
 0x23a   : > { %v1091_v38 = vpop.f32.mrf.mxu0  ;;  %v1351_v39 = vpop.f32.mrf.mxu1  ;;  %2724 = vmatprep.subr.bf16.mxu1 %v3011_v9 }
 0x23b   : > { %v1092_v40 = vadd.f32 %v2431_v35, %v1091_v38  ;;  %v1352_v41 = vadd.f32 %v2436_v36, %v1351_v39 }
 0x23c   : > { %v2640_v43 = vpop.f32.mrf.mxu0  ;;  %v2680_v44 = vpop.f32.mrf.mxu1 }
 0x23d   : > { %v1363_v46 = vpack.c.bf16 %v1092_v40, %v1092_v40  ;;  %v3391_v47 = vpack.c.bf16 %v1352_v41, %v1352_v41 }
 0x23e   : > { %v1094_v48 = vpop.f32.mrf.mxu0  ;;  %v1354_v49 = vpop.f32.mrf.mxu1 }
 0x23f   : > { %v1462_v50 = vsel %vm1365_vm2, %v1363_v46, 0  ;;  %2223 = vst.msk [vmem:[%s3340_s19 + $0x8] sm:$0xf] %vm2220_vm3, %v1363_v46  ;;  %2228 = vst.msk [vmem:[%s3375_s20 + $0xc] sm:$0xf] %vm2220_vm3, %v3391_v47  ;;  %2685 = vmatmul.mubr.msk.bf16.vlgmr.msra.gmra.mxu0 %vm1365_vm2, %v1357_v45  ;;  %v1753_v14 = vsel %vm1613_vm4, %v3391_v47, 0 }
 0x240   : > { %v2641_v51 = vpop.f32.mrf.mxu0  ;;  %v2681_v52 = vpop.f32.mrf.mxu1  ;;  %2695 = vmatpush3.bf16.xpose.msra.mxu0 %v1462_v50  ;;  %2696 = vmatprep.mubr.msk.bf16.mxu0 %vm3012_vm1, %v3011_v9  ;;  %s3013_s19 = smov [#allocation4]  }
 0x241   : > { %2706 = vmatprep.subr.bf16.mxu0 %v3011_v9  ;;  %s2897_s4 = sshll.u32 %s3013_s19, 4  ;;  %s2898_s4 = int_to_ptr.vmem [resolvable:$false] %s2897_s4 }
 0x242   : > { %v1195_v55 = vpop.f32.mrf.mxu0  ;;  %s2899_s5 = scalar_lea.vmem %s2898_s4, 512  ;;  %p2900_p0 = scmp.lt.s32.totalorder %s3551_s2, %s2898_s4 }
 0x243   : > { %v1196_v56 = vadd.f32 %v2433_v53, %v1195_v55  ;;  %p2901_p1 = scmp.lt.s32.totalorder %s2899_s5, %s2893_s3 }
 0x244   : > { %v2656_v57 = vpop.f32.mrf.mxu0 }
 0x245   : > { %v1606_v59 = vpack.c.bf16 %v1196_v56, %v1196_v56  ;;  %p2902_p2 = por %p2901_p1, %p2900_p0 }
 0x246   : > { %v1198_v60 = vpop.f32.mrf.mxu0 }
 0x247   : > { %v1615_v61 = vsel %vm1613_vm4, %v1606_v59, 0  ;;  %2225 = vst.msk [vmem:[%s3375_s20] sm:$0xf] %vm2220_vm3, %v1606_v59  ;;  %2697 = vmatmul.mubr.msk.bf16.vlgmr.msra.gmra.mxu0 %vm1365_vm2, %v1359_v58  ;;  %p2903_p3 = pnand %p2902_p2, %p2896_p13 }
 0x248   : > { %v2657_v62 = vpop.f32.mrf.mxu0  ;;  %2707 = vmatpush3.bf16.msra.mxu0 %v1615_v61  ;;  %2708 = vmatprep.mubr.msk.bf16.mxu0 %vm3012_vm1, %v3011_v9 }
 0x249   : > { %2718 = vmatprep.subr.bf16.mxu0 %v3011_v9 }
 0x24a   : > { %v1299_v1 = vpop.f32.mrf.mxu0 }
 0x24b   : > { %v1300_v2 = vadd.f32 %v2435_v63, %v1299_v1 }
 0x24c   : > { %v2672_v3 = vpop.f32.mrf.mxu0 }
 0x24d   : > { %v3420_v4 = vpack.c.bf16 %v1300_v2, %v1300_v2 }
 0x24e   : > { %v1302_v5 = vpop.f32.mrf.mxu0 }
 0x24f   : > { %2227 = vst.msk [vmem:[%s3375_s20 + $0x8] sm:$0xf] %vm2220_vm3, %v3420_v4 }
 0x250   : > { %v2673_v6 = vpop.f32.mrf.mxu0 }
 0x2ef   : > { %v1452_v7 = vpop.f32.mrf.mxu1 }
 0x2f0   : > { %v1551_v21 = vmul.f32 0.35355338, %v1452_v7 }
 0x2f1   : > { %v2692_v8 = vpop.f32.mrf.mxu1 }
 0x2f2   : > { %v1555_v29 = vadd.f32 %v1551_v21, %v565_v24  ;;  %v1707_v8 = vsel %vm1613_vm4, %v3420_v4, 0  ;;  %v1799_v4 = vld [vmem:[%s3715_s6] sm:$0xf]  ;;  %v1801_v21 = vld [vmem:[%s3715_s6 + $0x8] sm:$0xf] }
 0x2f3   : > { %v1455_v10 = vpop.f32.mrf.mxu1 }
 0x2f4   : > { %v1561_v33 = vsel %vm1365_vm2, %v1555_v29, -inf }
 0x2f5   : > { %v2693_v12 = vpop.f32.mrf.mxu1 }
 0x2f7   : > { %v1544_v13 = vpop.f32.mrf.mxu1 }
 0x2f8   : > { %v1553_v27 = vmul.f32 0.35355338, %v1544_v13 }
 0x2f9   : > { %v2704_v17 = vpop.f32.mrf.mxu1 }
 0x2fa   : > { %v1557_v34 = vadd.f32 %v1553_v27, %v565_v24 }
 0x2fb   : > { %v1547_v18 = vpop.f32.mrf.mxu1 }
 0x2fc   : > { %v1567_v38 = vsel %vm1365_vm2, %v1557_v34, -inf  ;;  %v1807_v18 = vsel %vm1613_vm4, %v1799_v4, 0 }
 0x2fd   : > { %v2705_v19 = vpop.f32.mrf.mxu1 }
 0x2fe   : > { %v1800_v19 = vld [vmem:[%s3715_s6 + $0x4] sm:$0xf] }
 0x2ff   : > { %v1406_v20 = vpop.f32.mrf.mxu0 }
 0x300   : > { %v1550_v22 = vmul.f32 0.35355338, %v1406_v20  ;;  %v1853_v20 = vsel %vm1613_vm4, %v1800_v19, 0 }
 0x301   : > { %v2686_v23 = vpop.f32.mrf.mxu0 }
 0x302   : > { %v1554_v25 = vadd.f32 %v1550_v22, %v565_v24 }
 0x303   : > { %v1409_v26 = vpop.f32.mrf.mxu0 }
 0x304   : > { %v1558_v28 = vsel %vm1365_vm2, %v1554_v25, -inf  ;;  %v1802_v26 = vld [vmem:[%s3715_s6 + $0xc] sm:$0xf] }
 0x305   : > { %1559 = vmax.xlane.f32.xlu1 %v1558_v28  ;;  %v2687_v30 = vpop.f32.mrf.mxu0 }
 0x306   : > { %v1945_v30 = vsel %vm1613_vm4, %v1802_v26, 0  ;;  %v2861_v26 = vld [vmem:[%s3684_s12 + $0x38] sm:$0xff]  }
 0x307   : > { %v1498_v31 = vpop.f32.mrf.mxu0 }
 0x308   : > { %v1552_v32 = vmul.f32 0.35355338, %v1498_v31 }
 0x309   : > { %1562 = vmax.xlane.f32.xlu1 %v1561_v33  ;;  %v2698_v35 = vpop.f32.mrf.mxu0 }
 0x30a   : > { %v1556_v36 = vadd.f32 %v1552_v32, %v565_v24  ;;  %v1899_v24 = vsel %vm1613_vm4, %v1801_v21, 0 }
 0x30b   : > { %v1501_v37 = vpop.f32.mrf.mxu0 }
 0x30c   : > { %v1564_v39 = vsel %vm1365_vm2, %v1556_v36, -inf }
 0x30d   : > { %1568 = vmax.xlane.f32.xlu1 %v1567_v38  ;;  %1565 = vmax.xlane.f32.xlu0 %v1564_v39  ;;  %v2699_v40 = vpop.f32.mrf.mxu0 }
 0x38e   : > { %v1560_v41 = vpop.xlane.xlu1 %1559 }
 0x38f   : > { %v1570_v43 = vsub.f32 %v1554_v25, %v1560_v41 }
 0x391   : > { %v1574_v44 = vmul.f32 1.442695, %v1570_v43 }
 0x392   : > { %v1563_v45 = vpop.xlane.xlu1 %1562 }
 0x393   : > { %2871 = vpow2.f32 %v1574_v44  ;;  %v1571_v46 = vsub.f32 %v1555_v29, %v1563_v45 }
 0x395   : > { %v1576_v42 = vmul.f32 1.442695, %v1571_v46 }
 0x396   : > { %v1569_v48 = vpop.xlane.xlu1 %1568  ;;  %v1566_v49 = vpop.xlane.xlu0 %1565 }
 0x397   : > { %2873 = vpow2.f32 %v1576_v42  ;;  %v1573_v50 = vsub.f32 %v1557_v34, %v1569_v48  ;;  %v1572_v51 = vsub.f32 %v1556_v36, %v1566_v49 }
 0x399   : > { %v1580_v52 = vmul.f32 1.442695, %v1573_v50  ;;  %v1578_v53 = vmul.f32 1.442695, %v1572_v51 }
 0x39b   : > { %2875 = vpow2.f32 %v1580_v52 }
 0x39c   : > { %2877 = vpow2.f32 %v1578_v53 }
 0x3a0   : > { %v2872_v54 = vpop.eup %2871 }
 0x3a1   : > { %v1582_v55 = vsel %vm1365_vm2, %v2872_v54, 0.0 }
 0x3a2   : > { %1583 = vadd.xlane.f32.xlu0 %v1582_v55 }
 0x3a4   : > { %v2874_v56 = vpop.eup %2873 }
 0x3a5   : > { %v1585_v57 = vsel %vm1365_vm2, %v2874_v56, 0.0 }
 0x3a6   : > { %1586 = vadd.xlane.f32.xlu1 %v1585_v57 }
 0x3a8   : > { %v2876_v58 = vpop.eup %2875 }
 0x3a9   : > { %v2878_v59 = vpop.eup %2877  ;;  %v1591_v60 = vsel %vm1365_vm2, %v2876_v58, 0.0 }
 0x3aa   : > { %1592 = vadd.xlane.f32.xlu1 %v1591_v60  ;;  %v1588_v61 = vsel %vm1365_vm2, %v2878_v59, 0.0 }
 0x3ab   : > { %1589 = vadd.xlane.f32.xlu0 %v1588_v61 }
 0x42b   : > { %v1584_v62 = vpop.xlane.xlu0 %1583 }
 0x42c   : > { %2879 = vrcp.f32 %v1584_v62 }
 0x42f   : > { %v1587_v63 = vpop.xlane.xlu1 %1586 }
 0x430   : > { %2881 = vrcp.f32 %v1587_v63 }
 0x433   : > { %v1593_v1 = vpop.xlane.xlu1 %1592 }
 0x434   : > { %2883 = vrcp.f32 %v1593_v1  ;;  %v1590_v2 = vpop.xlane.xlu0 %1589  ;;  %v2485_v1 = vld [vmem:[%s3679_s7] ss:$0 sm:$0xff] }
 0x435   : > { %2885 = vrcp.f32 %v1590_v2 }
 0x439   : > { %v2880_v3 = vpop.eup %2879 }
 0x43a   : > { %v1598_v5 = vmul.f32 %v2880_v3, %v2872_v54 }
 0x43c   : > { %v1602_v6 = vpack.c.bf16 %v1598_v5, %v1598_v5 }
 0x43d   : > { %v2882_v7 = vpop.eup %2881 }
 0x43e   : > { %2709 = vmatmul.mubr.msk.bf16.vlgmr.msra.gmra.mxu0 %vm1365_vm2, %v1602_v6  ;;  %v1599_v10 = vmul.f32 %v2882_v7, %v2874_v56 }
 0x43f   : > { %2719 = vmatpush3.bf16.msra.mxu0 %v1707_v8  ;;  %2720 = vmatprep.mubr.msk.bf16.mxu0 %vm3012_vm1, %v3011_v9 }
 0x440   : > { %v1603_v11 = vpack.c.bf16 %v1599_v10, %v1599_v10  ;;  %2730 = vmatprep.subr.bf16.mxu0 %v3011_v9 }
 0x441   : > { %v2884_v12 = vpop.eup %2883 }
 0x442   : > { %v2886_v13 = vpop.eup %2885  ;;  %2715 = vmatmul.mubr.msk.bf16.vlgmr.msra.gmra.mxu1 %vm1365_vm2, %v1603_v11  ;;  %v1601_v16 = vmul.f32 %v2884_v12, %v2876_v58 }
 0x443   : > { %2725 = vmatpush3.bf16.msra.mxu1 %v1753_v14  ;;  %v1600_v15 = vmul.f32 %v2886_v13, %v2878_v59  ;;  %2726 = vmatprep.mubr.msk.bf16.mxu1 %vm3012_vm1, %v3011_v9 }
 0x444   : > { %2736 = vmatprep.subr.bf16.mxu1 %v3011_v9  ;;  %v1605_v47 = vpack.c.bf16 %v1601_v16, %v1601_v16  ;;  %v2859_v16 = vld [vmem:[%s3682_s10 + $0x8] sm:$0xff]  }
 0x445   : > { %v1604_v17 = vpack.c.bf16 %v1600_v15, %v1600_v15 }
 0x447   : > { %2721 = vmatmul.mubr.msk.bf16.vlgmr.msra.gmra.mxu0 %vm1365_vm2, %v1604_v17 }
 0x448   : > { %2731 = vmatpush3.bf16.msra.mxu0 %v1807_v18  ;;  %2732 = vmatprep.mubr.msk.bf16.mxu0 %vm3012_vm1, %v3011_v9 }
 0x449   : > { %2742 = vmatprep.subr.bf16.mxu0 %v3011_v9 }
 0x44a   : > { %2727 = vmatmul.mubr.msk.bf16.vlgmr.msra.gmra.mxu1 %vm1365_vm2, %v1605_v47 }
 0x44b   : > { %2738 = vmatprep.mubr.msk.bf16.mxu1 %vm3012_vm1, %v3011_v9  ;;  %2737 = vmatpush3.bf16.msra.mxu1 %v1853_v20  ;;  %v2486_v20 = vld [vmem:[%s3680_s8] ss:$0 sm:$0xff] }
 0x44c   : > { %2748 = vmatprep.subr.bf16.mxu1 %v3011_v9 }
 0x4fe   : > { %v1651_v22 = vpop.f32.mrf.mxu0 }
 0x4ff   : > { %v1795_v23 = vpack.c.bf16 %v1651_v22, %v1651_v22  ;;  %v2487_v22 = vld [vmem:[%s3681_s9] ss:$0 sm:$0xff] }
 0x500   : > { %v2710_v25 = vpop.f32.mrf.mxu0 }
 0x501   : > { %2733 = vmatmul.mubr.msk.bf16.vlgmr.msra.gmra.mxu0 %vm1365_vm2, %v1795_v23 }
 0x502   : > { %v1654_v27 = vpop.f32.mrf.mxu0  ;;  %v1697_v28 = vpop.f32.mrf.mxu1  ;;  %2743 = vmatpush3.bf16.msra.mxu0 %v1899_v24  ;;  %2744 = vmatprep.mubr.msk.bf16.mxu0 %vm3012_vm1, %v3011_v9 }
 0x503   : > { %v1796_v29 = vpack.c.bf16 %v1697_v28, %v1697_v28  ;;  %2754 = vmatprep.subr.bf16.mxu0 %v3011_v9  ;;  %v2862_v27 = vld [vmem:[%s3684_s12 + $0x30] sm:$0xff]   ;;  %v2863_v28 = vld [vmem:[%s3684_s12 + $0x28] sm:$0xff]  }
 0x504   : > { %v2711_v31 = vpop.f32.mrf.mxu0  ;;  %v2716_v32 = vpop.f32.mrf.mxu1 }
 0x505   : > { %2739 = vmatmul.mubr.msk.bf16.vlgmr.msra.gmra.mxu1 %vm1365_vm2, %v1796_v29  ;;  %v2864_v29 = vld [vmem:[%s3684_s12 + $0x20] sm:$0xff]   ;;  %v2866_v31 = vld [vmem:[%s3684_s12 + $0x10] sm:$0xff]   ;;  %v2867_v32 = vld [vmem:[%s3684_s12 + $0x8] sm:$0xff]  }
 0x506   : > { %v1700_v33 = vpop.f32.mrf.mxu1  ;;  %2749 = vmatpush3.bf16.msra.mxu1 %v1945_v30  ;;  %2750 = vmatprep.mubr.msk.bf16.mxu1 %vm3012_vm1, %v3011_v9  ;;  %v2865_v30 = vld [vmem:[%s3684_s12 + $0x18] sm:$0xff]  }
 0x507   : > { %v1743_v34 = vpop.f32.mrf.mxu0  ;;  %2762 = vmatprep.subr.bf16.mxu1 %v3011_v9  ;;  %v2868_v33 = vld [vmem:[%s3684_s12] sm:$0xff]  }
 0x508   : > { %v1797_v35 = vpack.c.bf16 %v1743_v34, %v1743_v34  ;;  %v2717_v36 = vpop.f32.mrf.mxu1  ;;  %v2488_v34 = vld [vmem:[%s3683_s11] ss:$0 sm:$0xff] }
 0x509   : > { %v2722_v37 = vpop.f32.mrf.mxu0 }
 0x50a   : > { %2745 = vmatmul.mubr.msk.bf16.vlgmr.msra.gmra.mxu0 %vm1365_vm2, %v1797_v35  ;;  %v1789_v38 = vpop.f32.mrf.mxu1 }
 0x50b   : > { %v1746_v39 = vpop.f32.mrf.mxu0  ;;  %v1798_v40 = vpack.c.bf16 %v1789_v38, %v1789_v38  ;;  %2758 = vmatprep.mubr.msk.bf16.mxu0 %vm3012_vm1, %v3011_v9  ;;  %2755 = vmatpush3.bf16.msra.mxu0 %v2859_v16 }
 0x50c   : > { %v2728_v41 = vpop.f32.mrf.mxu1  ;;  %2756 = vmatprep.subr.bf16.mxu0 %v3011_v9 }
 0x50d   : > { %v2723_v43 = vpop.f32.mrf.mxu0  ;;  %2751 = vmatmul.mubr.msk.bf16.vlgmr.msra.gmra.mxu1 %vm1365_vm2, %v1798_v40 }
 0x50e   : > { %v1792_v44 = vpop.f32.mrf.mxu1  ;;  %2778 = vmatprep.mubr.msk.bf16.mxu1 %vm3012_vm1, %v3011_v9  ;;  %2763 = vmatpush3.bf16.msra.mxu1 %v2861_v26 }
 0x50f   : > { %2764 = vmatprep.subr.bf16.mxu1 %v3011_v9 }
 0x510   : > { %v2729_v45 = vpop.f32.mrf.mxu1 }
 0x512   : > { %2765 = vmatpush3.bf16.msra.mxu1 %v2862_v27 }
 0x513   : > { %2766 = vmatprep.subr.bf16.mxu1 %v3011_v9 }
 0x516   : > { %2767 = vmatpush3.bf16.msra.mxu1 %v2863_v28 }
 0x517   : > { %2768 = vmatprep.subr.bf16.mxu1 %v3011_v9 }
 0x51a   : > { %2769 = vmatpush3.bf16.msra.mxu1 %v2864_v29 }
 0x51b   : > { %2770 = vmatprep.subr.bf16.mxu1 %v3011_v9 }
 0x51e   : > { %2771 = vmatpush3.bf16.msra.mxu1 %v2865_v30 }
 0x51f   : > { %2772 = vmatprep.subr.bf16.mxu1 %v3011_v9 }
 0x522   : > { %2773 = vmatpush3.bf16.msra.mxu1 %v2866_v31 }
 0x523   : > { %2774 = vmatprep.subr.bf16.mxu1 %v3011_v9 }
 0x526   : > { %2775 = vmatpush3.bf16.msra.mxu1 %v2867_v32 }
 0x527   : > { %2776 = vmatprep.subr.bf16.mxu1 %v3011_v9 }
 0x52a   : > { %2777 = vmatpush3.bf16.msra.mxu1 %v2868_v33 }
 0x5c1   : > { %v1843_v46 = vpop.f32.mrf.mxu0 }
 0x5c2   : > { %v1987_v54 = vsel %vm568_vm0, %v1843_v46, 0.0 }
 0x5c3   : > { %v2734_v42 = vpop.f32.mrf.mxu0 }
 0x5c5   : > { %v1846_v48 = vpop.f32.mrf.mxu0  ;;  %v1889_v49 = vpop.f32.mrf.mxu1 }
 0x5c6   : > { %v1988_v52 = vsel %vm568_vm0, %v1889_v49, 0.0 }
 0x5c7   : > { %v2735_v50 = vpop.f32.mrf.mxu0  ;;  %v2740_v51 = vpop.f32.mrf.mxu1  ;;  %v1989_v56 = vadd.f32 %v1988_v52, %v1987_v54 }
 0x5c9   : > { %v1892_v53 = vpop.f32.mrf.mxu1 }
 0x5ca   : > { %v1935_v55 = vpop.f32.mrf.mxu0 }
 0x5cb   : > { %v1990_v57 = vsel %vm568_vm0, %v1935_v55, 0.0  ;;  %v2741_v58 = vpop.f32.mrf.mxu1 }
 0x5cc   : > { %v2746_v59 = vpop.f32.mrf.mxu0  ;;  %v1991_v60 = vadd.f32 %v1990_v57, %v1989_v56 }
 0x5cd   : > { %v1981_v61 = vpop.f32.mrf.mxu1 }
 0x5ce   : > { %v1938_v62 = vpop.f32.mrf.mxu0  ;;  %v1992_v63 = vsel %vm568_vm0, %v1981_v61, 0.0 }
 0x5cf   : > { %v1993_v2 = vadd.f32 %v1992_v63, %v1991_v60  ;;  %v2752_v3 = vpop.f32.mrf.mxu1 }
 0x5d0   : > { %v2747_v5 = vpop.f32.mrf.mxu0 }
 0x5d1   : > { %v2001_v6 = vadd.f32 %v2485_v1, %v1993_v2  ;;  %v1984_v7 = vpop.f32.mrf.mxu1 }
 0x5d3   : > { %v2753_v8 = vpop.f32.mrf.mxu1  ;;  %v3496_v10 = vadd.f32 %v2001_v6, %v3161_v0  ;;  %v2860_v0 = vld [vmem:[%s3682_s10] sm:$0xff]  }
 0x5d4   : > { %2757 = vmatpush3.bf16.msra.mxu0 %v2860_v0 }
 0x5d5   : > { %v2005_v11 = vsel %vm568_vm0, %v3496_v10, 0.0 }
 0x5d6   : > { %2006 = vadd.xlane.f32.xlu0 %v2005_v11 }
 0x65f   : > { %v2007_v12 = vpop.xlane.xlu0 %2006 }
 0x660   : > { %v2008_v13 = vmul.f32 0.03125, %v2007_v12 }
 0x662   : > { %v2009_v14 = vsub.f32 %v3496_v10, %v2008_v13 }
 0x664   : > { %v2010_v4 = vmul.f32 %v2009_v14, %v2009_v14 }
 0x666   : > { %v2011_v15 = vsel %vm568_vm0, %v2010_v4, 0.0 }
 0x667   : > { %2012 = vadd.xlane.f32.xlu1 %v2011_v15 }
 0x6f0   : > { %v2013_v17 = vpop.xlane.xlu1 %2012 }
 0x6f1   : > { %v2014_v18 = vmul.f32 0.03125, %v2013_v17 }
 0x6f3   : > { %v2015_v47 = vadd.f32 1e-05, %v2014_v18 }
 0x6f5   : > { %2887 = vrsqrt.f32 %v2015_v47 }
 0x702   : > { %v2888_v19 = vpop.eup %2887 }
 0x703   : > { %v2017_v21 = vmul.f32 %v2888_v19, %v2009_v14 }
 0x705   : > { %v2024_v23 = vmul.f32 %v2486_v20, %v2017_v21 }
 0x707   : > { %v2031_v24 = vadd.f32 %v2487_v22, %v2024_v23 }
 0x709   : > { %v2032_v25 = vpack.c.bf16 %v2031_v24, %v2031_v24 }
 0x70b   : > { %2759 = vmatmul.mubr.msk.bf16.vlgmr.msra.gmra.mxu0 %vm568_vm0, %v2032_v25 }
 0x7cb   : > { %v2093_v35 = vpop.f32.mrf.mxu0 }
 0x7cc   : > { %v2094_v36 = vadd.f32 %v2488_v34, %v2093_v35 }
 0x7cd   : > { %v2760_v37 = vpop.f32.mrf.mxu0 }
 0x7ce   : > { %v2492_v38 = vmul.f32 -1.442695, %v2094_v36 }
 0x7cf   : > { %v2096_v39 = vpop.f32.mrf.mxu0 }
 0x7d0   : > { %2889 = vpow2.f32 %v2492_v38 }
 0x7d1   : > { %v2761_v9 = vpop.f32.mrf.mxu0 }
 0x7dd   : > { %v2890_v40 = vpop.eup %2889 }
 0x7de   : > { %v2102_v41 = vadd.f32 1.0, %v2890_v40 }
 0x7e0   : > { %2891 = vrcp.f32 %v2102_v41 }
 0x7ed   : > { %v2892_v43 = vpop.eup %2891 }
 0x7ee   : > { %v2105_v44 = vmul.f32 %v2892_v43, %v2094_v36 }
 0x7f0   : > { %v2106_v45 = vpack.c.bf16 %v2105_v44, %v2105_v44 }
 0x7f2   : > { %2779 = vmatmul.mubr.bf16.vlgmr.msra.gmra.mxu1 %v2106_v45 }
 0x7f3   : > { %2906 = shalt.err (!%p2903_p3)
}
 0x7f4   : > { %s2907_s26 = scalar_lea.hbm %s3561_s23, 256  ;;  %s2911_s19 = scalar_lea.hbm %s3687_s15, 512 }
 0x7f5   : > { %p2908_p4 = scmp.ne.s32.totalorder %s3561_s23, %s2907_s26  ;;  %p2912_p9 = scmp.lt.s32.totalorder %s3561_s23, %s3687_s15 }
 0x7f6   : > { %p2913_p10 = scmp.lt.s32.totalorder %s2911_s19, %s2907_s26 }
 0x7f7   : > { %p2909_p7 = pnand %p2908_p4, %p3143_p5 }
 0x7f8   : > { %p2914_p11 = por %p2913_p10, %p2912_p9 }
 0x7f9   : > { %p2910_p8 = pneg %p2909_p7 }
 0x7fb   : > { %p2915_p12 = pnand %p2914_p11, %p2910_p8 }
 0x7fd   : > { %2918 = shalt.err (!%p2915_p12)
}
 0x7fe   : > { %s3695_s3 = smov 64   ;;  %s3015_s4 = smov 4  }
 0x7ff   : > { %2783 = dma.vmem_to_hbm [thread:$0]  (%p3143_p5), %s3551_s2, 256, %s3561_s23, %s3563_s1, %s3695_s3, %s3695_s3, %s3015_s4  }
 0x800   : > { %s3716_s5 = sshll.u32 %s3375_s20, 4  ;;  %s3717_s29 = sshll.u32 %s3124_s25, 8  ;;  %s3591_s5 = int_to_ptr.vmem [resolvable:$true] %s3716_s5 }
 0x801   : > { %s2281_s30 = scalar_lea.hbm %s3688_s16, %s3717_s29  ;;  %s2919_s18 = scalar_lea.vmem %s3591_s5, 256 }
 0x802   : > { %p2920_p13 = scmp.ne.s32.totalorder %s3591_s5, %s2919_s18  ;;  %s3016_s19 = smov [#allocation6]  }
 0x803   : > { %s2923_s6 = sshll.u32 %s3016_s19, 4  ;;  %s2924_s6 = int_to_ptr.vmem [resolvable:$false] %s2923_s6 }
 0x804   : > { %p2921_p0 = pnand %p2920_p13, %p3143_p5  ;;  %s2925_s2 = scalar_lea.vmem %s2924_s6, 512 }
 0x805   : > { %p2926_p2 = scmp.lt.s32.totalorder %s3591_s5, %s2924_s6  ;;  %p2927_p3 = scmp.lt.s32.totalorder %s2925_s2, %s2919_s18 }
 0x806   : > { %p2922_p1 = pneg %p2921_p0 }
 0x807   : > { %p2928_p4 = por %p2927_p3, %p2926_p2 }
 0x809   : > { %p2929_p7 = pnand %p2928_p4, %p2922_p1 }
 0x80b   : > { %2932 = shalt.err (!%p2929_p7)
}
 0x80c   : > { %s2933_s20 = scalar_lea.hbm %s2281_s30, 256  ;;  %s2937_s28 = scalar_lea.hbm %s3688_s16, 512 }
 0x80d   : > { %p2934_p8 = scmp.ne.s32.totalorder %s2281_s30, %s2933_s20  ;;  %p2938_p11 = scmp.lt.s32.totalorder %s2281_s30, %s3688_s16 }
 0x80e   : > { %p2939_p12 = scmp.lt.s32.totalorder %s2937_s28, %s2933_s20 }
 0x80f   : > { %p2935_p9 = pnand %p2934_p8, %p3143_p5 }
 0x810   : > { %p2940_p13 = por %p2939_p12, %p2938_p11 }
 0x811   : > { %p2936_p10 = pneg %p2935_p9 }
 0x813   : > { %p2941_p0 = pnand %p2940_p13, %p2936_p10 }
 0x815   : > { %2944 = shalt.err (!%p2941_p0)
}
 0x816   : > { %s3718_s6 = smov 64   ;;  %s2418_s18 = sshll.u32 %s3328_s27, 3  ;;  %v2493_v46 = vld [vmem:[%s3685_s13] ss:$0 sm:$0xff] }
 0x817   : > { %2784 = dma.vmem_to_hbm [thread:$0]  (%p3143_p5), %s3591_s5, 256, %s2281_s30, %s3563_s1, %s3718_s6, %s3718_s6, %s3015_s4  }
 0x818   : > { %s2505_s3 = sshll.u32 %s3124_s25, 7  ;;  %s527_s20 = scalar_lea.vmem [#allocation2], %s2418_s18 }
 0x819   : > { %s2253_s23 = sshll.u32 %s527_s20, 4  ;;  %s3627_s26 = scalar_lea.hbm %s3686_s14, %s2505_s3  ;;  %s3629_s23 = int_to_ptr.vmem [resolvable:$true] %s2253_s23 }
 0x81a   : > { %s2230_s25 = scalar_lea.sflag [#allocation3], %s3328_s27  ;;  %s2945_s1 = scalar_lea.vmem %s3629_s23, 128 }
 0x81b   : > { %p2946_p1 = scmp.ne.s32.totalorder %s3629_s23, %s2945_s1  ;;  %s3017_s4 = smov [#allocation2]  }
 0x81c   : > { %s2949_s5 = sshll.u32 %s3017_s4, 4  ;;  %s2950_s5 = int_to_ptr.vmem [resolvable:$false] %s2949_s5 }
 0x81d   : > { %p2947_p2 = pnand %p2946_p1, %p3143_p5  ;;  %s2951_s30 = scalar_lea.vmem %s2950_s5, 256 }
 0x81e   : > { %p2952_p4 = scmp.lt.s32.totalorder %s3629_s23, %s2950_s5  ;;  %p2953_p7 = scmp.lt.s32.totalorder %s2951_s30, %s2945_s1 }
 0x81f   : > { %p2948_p3 = pneg %p2947_p2 }
 0x820   : > { %p2954_p8 = por %p2953_p7, %p2952_p4 }
 0x822   : > { %p2955_p9 = pnand %p2954_p8, %p2948_p3 }
 0x8b2   : > { %v2212_v42 = vpop.f32.mrf.mxu1 }
 0x8b3   : > { %v2213_v48 = vadd.f32 %v2493_v46, %v2212_v42 }
 0x8b4   : > { %v2780_v49 = vpop.f32.mrf.mxu1 }
 0x8b5   : > { %v2218_v50 = vadd.f32 %v2213_v48, %v3496_v10 }
 0x8b6   : > { %v2215_v51 = vpop.f32.mrf.mxu1 }
 0x8b7   : > { %2219 = vst.msk [vmem:[%s527_s20] sm:$0xff] %vm568_vm0, %v2218_v50 }
 0x8b8   : > { %v2781_v52 = vpop.f32.mrf.mxu1 }
 0x8b9   : > { %2958 = shalt.err (!%p2955_p9)
}
 0x8ba   : > { %s2959_s6 = scalar_lea.hbm %s3627_s26, 128  ;;  %s2963_s19 = scalar_lea.hbm %s3686_s14, 256 }
 0x8bb   : > { %p2960_p10 = scmp.ne.s32.totalorder %s3627_s26, %s2959_s6  ;;  %p2964_p13 = scmp.lt.s32.totalorder %s3627_s26, %s3686_s14 }
 0x8bc   : > { %p2965_p0 = scmp.lt.s32.totalorder %s2963_s19, %s2959_s6 }
 0x8bd   : > { %p2961_p11 = pnand %p2960_p10, %p3143_p5 }
 0x8be   : > { %p2966_p1 = por %p2965_p0, %p2964_p13 }
 0x8bf   : > { %p2962_p12 = pneg %p2961_p11 }
 0x8c1   : > { %p2967_p2 = pnand %p2966_p1, %p2962_p12 }
 0x8c3   : > { %2970 = shalt.err (!%p2967_p2)
}
 0x8c4   : > { %2782 = dma.vmem_to_hbm [thread:$0]  (%p3143_p5), %s3629_s23, 128, %s3627_s26, %s2230_s25  }
 0x8c5 PF: > { %p2798_p3 = scmp.ge.s32.totalorder %s3009_s24, 2  ;;  %s2297_s20 = sand.u32 1, %s2997_s21  }
 0x8c6   : > { %s2298_s29 = scalar_lea.sflag [#allocation3], %s2297_s20 }
 0x8c7   : > { %p2789_p4 = pnand %p2798_p3, %p3147_p6 }
 0x8c9   : > { %p2790_p7 = pneg %p2789_p4 }
 0x8cb   : > { %2988 = dma.done.wait (%p2790_p7), %s2298_s29, 128  }
 0x8cc   : > { %2990 = vsyncadd (%p2790_p7), %s2298_s29, 4294967168  ;;  %s3719_s28 = sadd.s32 4294967294, %s3009_s24  }
 0x8cd   : > { %s2306_s1 = sand.u32 1, %s3719_s28  }
 0x8ce   : > { %s2307_s4 = scalar_lea.sflag [#allocation5], %s2306_s1 }
 0x8cf   : > { %2992 = dma.done.wait (%p2790_p7), %s2307_s4, 512  }
 0x8d0   : > { %2994 = vsyncadd (%p2790_p7), %s2307_s4, 4294966784  ;;  %s3720_s24 = sld [smem:[#allocation10_spill]]  ;;  %s3723_s21 = smov %s3001_s22 }
 0x8d1   : > { %s3721_s0 = sld [smem:[#allocation9_spill]] }
 0x8d2   : > { %s3722_s23 = sld [smem:[#allocation11_spill]] }
 0x8d6   : > { %p30_p5 = scmp.ge.s32.totalorder %s3720_s24, 4  }
 0x8d7   : > { %s3724_s22 = smov %s3721_s0 }
 0x8d8   :  { %32 = sbr.rel (!%p30_p5) target bundleno = 13 (0xd), region = 146 }
 0x8dd   :  { %2321 = vsyncpa [#allocation3], 1 }
 0x8de   :  { %2323 = vsyncpa [#allocation3 + $0x1], 1 }
 0x8df   :  { %2324 = vsyncpa [#allocation5], 1 }
 0x8e0   :  { %2326 = vsyncpa [#allocation5 + $0x1], 1 }

</bundles_post_ra>
